<compile_context>
chip_gen: v7x
topology: tpu7x:2x2x1
jax: 0.10.0
libtpu: 0.0.40
codegen_flags: <defaults>
</compile_context>

<pallas_src>
import jax
import jax.numpy as jnp
import numpy as np
from jax.experimental import pallas as pl
from jax.experimental.pallas import tpu as pltpu

_LANE = 128
_SUBLANE = 8
_VMEM_BUDGET_BYTES = 48 * 1024 * 1024   # stays inside v7x's 64 MiB physical VMEM


def _round_up(a, b):
    return ((a + b - 1) // b) * b


def _cdiv(a, b):
    return (a + b - 1) // b


def _sine_layer_kernel(x_ref, w_ref, b_ref, o_ref):
    # x_ref : (tm, F)   VMEM  streamed input row tile
    # w_ref : (F,  O)   VMEM  omega_0-pre-scaled weight, MXU-native (K, N) layout (resident)
    # b_ref : (1,  O)   VMEM  omega_0-pre-scaled bias (resident)
    # o_ref : (tm, O)   VMEM  output tile; single lane-dense full-width store
    z = jnp.dot(x_ref[...], w_ref[...], preferred_element_type=jnp.float32)
    # TODO(synk): if a bundle dump confirms the VPU saturates on sin at larger shapes,
    # swap jnp.sin for a single-step Cody-Waite reduction + minimax polynomial.
    o_ref[...] = jnp.sin(z + b_ref[...]).astype(o_ref.dtype)


def _choose_row_tiling(M, tm_req, F, O):
    """Pick (tm_eff, n_steps): balanced grid steps, minimal padding, VMEM-safe."""
    tm_req = max(_SUBLANE,
                 _round_up(min(int(tm_req), _round_up(M, _SUBLANE)), _SUBLANE))
    # Number of grid steps at the requested tile size.
    n = _cdiv(M, tm_req)
    # Prefer >= 8 steps (balanced 2-TensorCore split on v7x, good DMA/compute
    # overlap) while keeping >= 128 rows per step to amortize per-step overhead.
    n = max(n, min(8, _cdiv(M, 128)), 1)
    # Balanced tile: pads < 8 rows per step instead of up to tm-1 rows total.
    tm_eff = _round_up(_cdiv(M, n), _SUBLANE)

    # VMEM guardrail: 2 buffers each for the streamed x/out blocks + resident W/b.
    o_pad = _round_up(O, _LANE)
    f_pad = _round_up(F, _LANE)
    per_row_bytes = 2 * (f_pad + o_pad) * 4
    resident_bytes = 2 * (_round_up(F, _SUBLANE) * o_pad + _SUBLANE * o_pad) * 4
    tm_cap = max(
        _SUBLANE,
        ((_VMEM_BUDGET_BYTES - resident_bytes) // per_row_bytes) // _SUBLANE * _SUBLANE,
    )
    tm_eff = min(tm_eff, tm_cap)

    n = _cdiv(M, tm_eff)
    return tm_eff, n


def sine_layer_forward(x, weight, bias=None, *, omega_0=30.0, tm=512,
                       out_dtype=jnp.float32):
    """SIREN SineLayer forward: sin(omega_0 * (x @ W.T + b)).

    x        : (..., in_features)
    weight   : (out_features, in_features)
    bias     : (out_features,) or None
    out_dtype: output dtype (use jnp.bfloat16 on v5e to halve HBM writeback).
    """
    orig_lead = x.shape[:-1]
    F = x.shape[-1]
    O = weight.shape[0]
    M = int(np.prod(orig_lead)) if orig_lead else 1

    if M == 0:  # empty batch: nothing to compute, avoid a zero-size grid
        return jnp.zeros((*orig_lead, O), out_dtype)

    x2 = x.reshape(M, F).astype(jnp.float32)
    # Fold omega_0 into the (tiny, resident) params once, outside the kernel, and
    # pre-transpose W to the MXU-native (K, N) layout so the in-kernel contraction
    # is canonical (no per-step XLU relayout of the RHS).
    # TODO(synk): for in_features >= 256, cast x2/w_t to bf16 here (keep the f32
    # accumulation) to use the native bf16 MXU path and halve x-side DMA.
    w_t = (omega_0 * weight.astype(jnp.float32)).T              # (F, O)
    if bias is None:
        b2 = jnp.zeros((1, O), jnp.float32)
    else:
        b2 = (omega_0 * bias.astype(jnp.float32)).reshape(1, O)  # (1, O)

    tm_eff, n_steps = _choose_row_tiling(M, tm, F, O)
    M_pad = n_steps * tm_eff
    if M_pad != M:
        x2 = jnp.pad(x2, ((0, M_pad - M), (0, 0)))

    out = pl.pallas_call(
        _sine_layer_kernel,
        out_shape=jax.ShapeDtypeStruct((M_pad, O), out_dtype),
        grid_spec=pltpu.PrefetchScalarGridSpec(
            num_scalar_prefetch=0,
            grid=(n_steps,),
            in_specs=[
                pl.BlockSpec((tm_eff, F), lambda i: (i, 0)),   # streamed rows
                # Resident operands (constant index_map -> fetched once).
                # TODO(synk): pipeline_mode=pl.Buffered(1) would drop their dead
                # second buffer (~1 MiB saved for 512x512 SIREN hidden layers).
                pl.BlockSpec((F, O), lambda i: (0, 0)),        # resident weight (K, N)
                pl.BlockSpec((1, O), lambda i: (0, 0)),        # resident bias
            ],
            out_specs=pl.BlockSpec((tm_eff, O), lambda i: (i, 0)),
        ),
        compiler_params=pltpu.CompilerParams(
            dimension_semantics=("parallel",),
            vmem_limit_bytes=_VMEM_BUDGET_BYTES,
        ),
    )(x2, w_t, b2)

    out = out[:M]
    return out.reshape(*orig_lead, O)


def sine_layer_reference(x, weight, bias=None, *, omega_0=30.0):
    """Pure-JAX reference mirroring the PyTorch forward."""
    z = jnp.einsum('...f,of->...o', x.astype(jnp.float32),
                   weight.astype(jnp.float32))
    if bias is not None:
        z = z + bias.astype(jnp.float32)
    return jnp.sin(omega_0 * z)


if __name__ == "__main__":
    # Small shapes consistent with the module's forward (batch, in_features).
    in_features = 16
    out_features = 128      # lane-dense output width
    omega_0 = 30.0
    batch_size = 257        # ragged batch -> exercises the re-balanced tiling path

    key = jax.random.PRNGKey(0)
    kx, kw, kb = jax.random.split(key, 3)

    # SIREN init (is_first=False): W ~ U(-sqrt(6/F)/omega_0, sqrt(6/F)/omega_0)
    w_bound = float(np.sqrt(6.0 / in_features) / omega_0)
    weight = jax.random.uniform(kw, (out_features, in_features), jnp.float32,
                                minval=-w_bound, maxval=w_bound)
    # nn.Linear default bias init: U(-1/sqrt(F), 1/sqrt(F))
    b_bound = float(1.0 / np.sqrt(in_features))
    bias = jax.random.uniform(kb, (out_features,), jnp.float32,
                              minval=-b_bound, maxval=b_bound)

    x = jax.random.normal(kx, (batch_size, in_features), jnp.float32)

    out = sine_layer_forward(x, weight, bias, omega_0=omega_0)
    out = jax.block_until_ready(out)

    ref = sine_layer_reference(x, weight, bias, omega_0=omega_0)
    assert out.shape == (batch_size, out_features), out.shape
    np.testing.assert_allclose(np.asarray(out), np.asarray(ref),
                               rtol=1e-4, atol=1e-4)
    print("KERNEL_OK")
</pallas_src>

<mosaic_0001>
module attributes {stable_mosaic.version = 11 : i64} {
  func.func @_sine_layer_kernel(%arg0: i32, %arg1: memref<88x16xf32, #tpu.memory_space<vmem>>, %arg2: memref<16x128xf32, #tpu.memory_space<vmem>>, %arg3: memref<1x128xf32, #tpu.memory_space<vmem>>, %arg4: memref<88x128xf32, #tpu.memory_space<vmem>>) attributes {dimension_semantics = [#tpu.dimension_semantics<parallel>], iteration_bounds = array<i64: 3>, scalar_prefetch = 0 : i64, scratch_operands = 0 : i64, tpu.core_type = #tpu.core_type<tc>, window_params = [{transform_indices = @transform_0, window_bounds = array<i64: 88, 16>}, {pipeline_mode = #tpu.pipeline_mode<synchronous>, transform_indices = @transform_1, window_bounds = array<i64: 16, 128>}, {pipeline_mode = #tpu.pipeline_mode<synchronous>, transform_indices = @transform_2, window_bounds = array<i64: 1, 128>}, {transform_indices = @transform_3, window_bounds = array<i64: 88, 128>}]} {
    %c0 = arith.constant 0 : index
    %c0_0 = arith.constant 0 : index
    %0 = vector.load %arg1[%c0, %c0_0] : memref<88x16xf32, #tpu.memory_space<vmem>>, vector<88x16xf32>
    %c0_1 = arith.constant 0 : index
    %c0_2 = arith.constant 0 : index
    %1 = vector.load %arg2[%c0_1, %c0_2] : memref<16x128xf32, #tpu.memory_space<vmem>>, vector<16x128xf32>
    %cst = arith.constant dense<0.000000e+00> : vector<88x128xf32>
    %2 = tpu.matmul %0, %1, %cst {dimension_numbers = #tpu.dot_dimension_numbers<[1], [0], [0], [1], [0, 0, 1, 1], [], []>} : vector<88x16xf32>, vector<16x128xf32>, vector<88x128xf32> -> vector<88x128xf32>
    %c0_3 = arith.constant 0 : index
    %c0_4 = arith.constant 0 : index
    %3 = vector.load %arg3[%c0_3, %c0_4] : memref<1x128xf32, #tpu.memory_space<vmem>>, vector<1x128xf32>
    %4 = vector.broadcast %3 : vector<1x128xf32> to vector<88x128xf32>
    %5 = arith.addf %2, %4 : vector<88x128xf32>
    %6 = math.sin %5 : vector<88x128xf32>
    %c0_5 = arith.constant 0 : index
    %c0_6 = arith.constant 0 : index
    %7 = vector.load %arg4[%c0_5, %c0_6] : memref<88x128xf32, #tpu.memory_space<vmem>>, vector<88x128xf32>
    tpu.vector_store %arg4[%c0_5, %c0_6], %6 {strides = array<i32>} : memref<88x128xf32, #tpu.memory_space<vmem>>, vector<88x128xf32>,
    return
  }
  func.func @transform_0(%arg0: i32) -> (i32, i32) {
    %c0_i32 = arith.constant 0 : i32
    %c0_i32_0 = arith.constant 0 : i32
    return %arg0, %c0_i32 : i32, i32
  }
  func.func @transform_1(%arg0: i32) -> (i32, i32) {
    %c0_i32 = arith.constant 0 : i32
    %c0_i32_0 = arith.constant 0 : i32
    %c0_i32_1 = arith.constant 0 : i32
    return %c0_i32, %c0_i32_0 : i32, i32
  }
  func.func @transform_2(%arg0: i32) -> (i32, i32) {
    %c0_i32 = arith.constant 0 : i32
    %c0_i32_0 = arith.constant 0 : i32
    %c0_i32_1 = arith.constant 0 : i32
    return %c0_i32, %c0_i32_0 : i32, i32
  }
  func.func @transform_3(%arg0: i32) -> (i32, i32) {
    %c0_i32 = arith.constant 0 : i32
    %c0_i32_0 = arith.constant 0 : i32
    return %arg0, %c0_i32 : i32, i32
  }
}

</mosaic_0001>

<bundles_post_ra>
// kernel: tpu_custom_call.1
= control target key start
LH: loop header
LB: loop body
LE: loop exit
PB: predicated region body
PF: predicated region fallthrough
CT: control target
= control target key end

     0   :  { %8 = vsyncpa [#allocation3], 0  ;;  %s2938_s0 = inlined_call_operand.vmem [shape: f32[264,16], index: 0, kind: input, shape index: {}]   ;;  %s2939_s1 = inlined_call_operand.vmem [shape: f32[16,128], index: 1, kind: input, shape index: {}]   ;;  %s2940_s2 = inlined_call_operand.vmem [shape: f32[1,128], index: 2, kind: input, shape index: {}]   ;;  %s2941_s3 = inlined_call_operand.hbm [shape: f32[264,128], index: 3, kind: output, shape index: {}]  }
   0x1   :  { %10 = vsyncpa [#allocation3 + $0x1], 0  ;;  %s1933_s12 = smov 0   ;;  %s1935_s13 = smov 0  }
   0x2   :  { %s1937_s14 = smov 0   ;;  %s1939_s15 = smov 0  }
   0x3 LB: > { %s1954_s16 = sadd.s32 4294967295, %s1899_s15   ;;  %s1577_s17 = sadd.s32 4294967294, %s1899_s15   ;;  %s1899_s15 = sphi %s1939_s15, %s2965_s15   ;;  %s1895_s14 = sphi %s1937_s14, %s2964_s14   ;;  %s1891_s13 = sphi %s1935_s13, %s2963_s13   ;;  %s1887_s12 = sphi %s1933_s12, %s2962_s12  }
   0x4   : > { %s1958_s18 = sadd.s32 1, %s1899_s15   ;;  %s91_s19 = sadd.s32 1, %s1895_s14 }
   0x5   : > { %s88_s20 = ssub.s32 %s1899_s15, %s1958_s18  ;;  %p101_p0 = scmp.ne.s32.totalorder %s1895_s14, %s1891_s13 }
   0x6   : > { %p89_p1 = scmp.eq.s32.totalorder %s88_s20, 0  ;;  %p102_p2 = scmp.eq.s32.totalorder %s1954_s16, 2 }
   0x7   : > { %p107_p3 = scmp.ne.s32.totalorder %s1891_s13, %s1887_s12  ;;  %p108_p4 = scmp.eq.s32.totalorder %s1577_s17, 2 }
   0x8   : > { %s1969_s21 = scalar_select %p89_p1, %s1895_s14, %s91_s19  }
   0x9   : > { %p1971_p5 = por %p102_p2, %p101_p0  ;;  %p1975_p6 = por %p108_p4, %p107_p3 }
   0xa   : > { %p1580_p7 = scmp.ge.s32.totalorder %s1899_s15, 1  ;;  %p141_p8 = scmp.lt.s32.totalorder %s1899_s15, 4 }
   0xc   : > { %p142_p9 = pnand %p1580_p7, %p141_p8 }
   0xd   : > { %v183_v0 = vld [vmem:[%s2939_s1] sm:$0xff] (!%p142_p9)  ;;  %v184_v1 = vld [vmem:[%s2939_s1 + $0x8] sm:$0xff] (!%p142_p9)  ;;  %s165_s28 = smul.u32 (!%p142_p9), 11, %s1954_s16  ;;  %v1901_v2 = vmov (!%p142_p9), 0.0|0.0   ;;  %vm1902_vm0 = vmmov (!%p142_p9), 0   ;;  %v1903_v4 = vmov (!%p142_p9), 0.0  }
   0xe   : > { %145 = sbr.rel (%p142_p9) target bundleno = 563 (0x233), region = 32  ;;  %1692 = vmatprep.subr.bf16.mxu0 (!%p142_p9), %v1901_v2  ;;  %1695 = vmatprep.subr.bf16.mxu1 (!%p142_p9), %v1901_v2  ;;  %v1693_v3 = vpack.c.bf16 (!%p142_p9), %v184_v1, %v183_v0  ;;  %vm192_vm1 = vcmask (!%p142_p9), 130048   ;;  %v2016_v16 = vld [vmem:[%s2940_s2] ss:$0 sm:$0xff] (!%p142_p9)  ;;  %v1904_v0 = vmov (!%p142_p9), 683565275  }
   0xf   : > { %1659 = vmatprep.mubr.msk.f32.mxu0 (!%p142_p9), %vm1902_vm0, %v1903_v4  ;;  %1677 = vmatprep.mubr.msk.f32.mxu1 (!%p142_p9), %vm1902_vm0, %v1903_v4  ;;  %p166_p10 = scmp.lt.s32.totalorder (!%p142_p9), %s165_s28, 32  ;;  %s162_s8 = sand.u32 (!%p142_p9), 1, %s1891_s13  }
  0x10   : > { %1694 = vmatpush3.bf16.msra.mxu0 (!%p142_p9), %v1693_v3  ;;  %1696 = vmatpush3.bf16.msra.mxu1 (!%p142_p9), %v1693_v3  ;;  %s2295_s9 = smul.u32 (!%p142_p9), 88, %s162_s8 }
  0x11   : > { %s1641_s19 = smul.u32 (!%p142_p9), 1408, %s1954_s16  ;;  %s2897_s16 = scalar_lea.sflag (!%p142_p9), [#allocation3], %s162_s8 }
  0x12   : > { %s2333_s10 = scalar_lea.vmem (!%p142_p9), [#allocation2], %s2295_s9 }
  0x13   : > { %s1515_s20 = sshll.u32 (!%p142_p9), %s2333_s10, 4  ;;  %s2889_s26 = scalar_lea.hbm (!%p142_p9), %s2941_s3, %s1641_s19  ;;  %s2892_s20 = int_to_ptr.vmem [resolvable:$true] %s1515_s20 }
  0x14   : > { %s1837_s27 = scalar_lea.vmem (!%p142_p9), %s2892_s20, 1408 }
  0x15   : > { %s2967_s28 = smov (!%p166_p10, %s165_s28), 32  ;;  %p1838_p11 = scmp.ne.s32.totalorder %s2892_s20, %s1837_s27 }
  0x16   : > { %s1581_s29 = sshll.u32 %s2967_s28, 3  ;;  %s1910_s28 = smov [#allocation2]  }
  0x17   : > { %s169_s5 = scalar_lea.vmem %s2938_s0, %s1581_s29  ;;  %p1839_p12 = pnand %p1838_p11, %p1971_p5 }
  0x18   : > { %v172_v5 = vld [vmem:[%s169_s5] sm:$0xff]  ;;  %v178_v6 = vld [vmem:[%s169_s5 + $0x30] sm:$0xff]  ;;  %v173_v7 = vld [vmem:[%s169_s5 + $0x8] sm:$0xff]  ;;  %s1841_s29 = sshll.u32 %s1910_s28, 4  ;;  %s1842_s29 = int_to_ptr.vmem [resolvable:$false] %s1841_s29 }
  0x19   : > { %1660 = vmatmul.mubr.msk.f32.vlgmr.msra.gmra.mrb[0].mxu0 %vm192_vm1, %v172_v5  ;;  %1678 = vmatmul.mubr.msk.f32.vlgmr.msra.gmra.mrb[0].mxu1 %vm192_vm1, %v178_v6  ;;  %v179_v8 = vld [vmem:[%s169_s5 + $0x38] sm:$0xff]  ;;  %v174_v9 = vld [vmem:[%s169_s5 + $0x10] sm:$0xff]  ;;  %v180_v10 = vld [vmem:[%s169_s5 + $0x40] sm:$0xff]  ;;  %v1906_v6 = vmov 2131351028   ;;  %p1840_p13 = pneg %p1839_p12  ;;  %s1843_s30 = scalar_lea.vmem %s1842_s29, 2816 }
  0x1a   : > { %1662 = vmatprep.mubr.msk.f32.mxu0 %vm1902_vm0, %v1903_v4  ;;  %1680 = vmatprep.mubr.msk.f32.mxu1 %vm1902_vm0, %v1903_v4  ;;  %v175_v11 = vld [vmem:[%s169_s5 + $0x18] sm:$0xff]  ;;  %v181_v12 = vld [vmem:[%s169_s5 + $0x48] sm:$0xff]  ;;  %v176_v13 = vld [vmem:[%s169_s5 + $0x20] sm:$0xff]  ;;  %p1844_p0 = scmp.lt.s32.totalorder %s2892_s20, %s1842_s29  ;;  %p1845_p1 = scmp.lt.s32.totalorder %s1843_s30, %s1837_s27 }
  0x1b   : > { %v182_v14 = vld [vmem:[%s169_s5 + $0x50] sm:$0xff]  ;;  %v177_v15 = vld [vmem:[%s169_s5 + $0x28] sm:$0xff] }
  0x1c   : > { %p1846_p2 = por %p1845_p1, %p1844_p0 }
  0x1d   : > { %1663 = vmatmul.mubr.msk.f32.gmra.mrb[2].mxu0 %vm192_vm1, %v173_v7  ;;  %1681 = vmatmul.mubr.msk.f32.gmra.mrb[2].mxu1 %vm192_vm1, %v179_v8  ;;  %v1907_v8 = vmov 2102212464  }
  0x1e   : > { %1665 = vmatprep.mubr.msk.f32.mxu0 %vm1902_vm0, %v1903_v4  ;;  %1683 = vmatprep.mubr.msk.f32.mxu1 %vm1902_vm0, %v1903_v4  ;;  %p1847_p3 = pnand %p1846_p2, %p1840_p13 }
  0x21   : > { %1666 = vmatmul.mubr.msk.f32.gmra.mrb[4].mxu0 %vm192_vm1, %v174_v9  ;;  %1684 = vmatmul.mubr.msk.f32.gmra.mrb[4].mxu1 %vm192_vm1, %v180_v10  ;;  %v1908_v10 = vmov 920167782  }
  0x22   : > { %1668 = vmatprep.mubr.msk.f32.mxu0 %vm1902_vm0, %v1903_v4  ;;  %1686 = vmatprep.mubr.msk.f32.mxu1 %vm1902_vm0, %v1903_v4 }
  0x25   : > { %1669 = vmatmul.mubr.msk.f32.gmra.mrb[6].mxu0 %vm192_vm1, %v175_v11  ;;  %1687 = vmatmul.mubr.msk.f32.gmra.mrb[6].mxu1 %vm192_vm1, %v181_v12 }
  0x26   : > { %1671 = vmatprep.mubr.msk.f32.mxu0 %vm1902_vm0, %v1903_v4  ;;  %1689 = vmatprep.mubr.msk.f32.mxu1 %vm1902_vm0, %v1903_v4 }
  0x29   : > { %1672 = vmatmul.mubr.msk.f32.gmra.mrb[8].mxu0 %vm192_vm1, %v176_v13  ;;  %1690 = vmatmul.mubr.msk.f32.gmra.mrb[8].mxu1 %vm192_vm1, %v182_v14 }
  0x2a   : > { %1674 = vmatprep.mubr.msk.f32.mxu0 %vm1902_vm0, %v1903_v4  ;;  %v1905_v4 = vmov 2475754826  }
  0x2d   : > { %1675 = vmatmul.mubr.msk.f32.gmra.mrb[10].mxu0 %vm192_vm1, %v177_v15 }
  0xec   : > { %v292_v17 = vpop.f32.mrb[0].mxu0  ;;  %v322_v18 = vpop.f32.mrb[0].mxu1 }
  0xed   : > { %v2019_v19 = vadd.f32 %v2016_v16, %v292_v17  ;;  %v2022_v20 = vadd.f32 %v2016_v16, %v322_v18  ;;  %v1661_v21 = vpop.f32.mrb[1].mxu0  ;;  %v1679_v22 = vpop.f32.mrb[1].mxu1  ;;  %v1909_v18 = vmov 1326507024  }
  0xef   : > { %v346_v23 = vand.u32 2147483647, %v2019_v19  ;;  %v349_v24 = vand.u32 2139095040, %v2019_v19  ;;  %v970_v25 = vand.u32 2147483647, %v2022_v20  ;;  %v973_v26 = vand.u32 2139095040, %v2022_v20 }
  0xf0   : > { %v297_v27 = vpop.f32.mrb[2].mxu0  ;;  %v327_v28 = vpop.f32.mrb[2].mxu1  ;;  %vm348_vm15 = vcmp.lt.s32.totalorder %v2019_v19, 0 }
  0xf1   : > { %v350_v29 = vshrl.u32 %v349_v24, 23  ;;  %v353_v30 = vand.u32 8388607, %v346_v23  ;;  %v2031_v31 = vadd.f32 %v2016_v16, %v297_v27  ;;  %v1664_v32 = vpop.f32.mrb[3].mxu0  ;;  %v974_v33 = vshrl.u32 %v973_v26, 23  ;;  %v1682_v35 = vpop.f32.mrb[3].mxu1 }
  0xf2   : > { %v977_v34 = vand.u32 8388607, %v970_v25  ;;  %v2044_v55 = vadd.f32 %v2016_v16, %v327_v28  ;;  %vm2153_vm0 = vcmp.le.f32.partialorder %v346_v23, 0.7853982 }
  0xf3   : > { %v1594_v36 = vadd.s32 4294967169, %v350_v29  ;;  %v1618_v37 = vadd.s32 4294967169, %v974_v33  ;;  %v453_v38 = vand.u32 2139095040, %v2031_v31  ;;  %v354_v41 = vor.u32 8388608, %v353_v30 }
  0xf4   : > { %v2036_v39 = vpop.f32.mrb[4].mxu0  ;;  %v2038_v40 = vpop.f32.mrb[4].mxu1  ;;  %v978_v43 = vor.u32 8388608, %v977_v34  ;;  %v450_v45 = vand.u32 2147483647, %v2031_v31 }
  0xf5   : > { %v356_v42 = vadd.s32 1, %v1594_v36  ;;  %v980_v44 = vadd.s32 1, %v1618_v37  ;;  %v454_v46 = vshrl.u32 %v453_v38, 23  ;;  %v1667_v47 = vpop.f32.mrb[5].mxu0  ;;  %v1685_v48 = vpop.f32.mrb[5].mxu1  ;;  %v2048_v58 = vshll.u32 %v354_v41, 8 }
  0xf6   : > { %v2052_v60 = vshll.u32 %v978_v43, 8  ;;  %v2056_v61 = vand.u32 8388607, %v450_v45 }
  0xf7   : > { %vm357_vm2 = vcmp.gt.s32.totalorder %v356_v42, 0  ;;  %vm981_vm3 = vcmp.gt.s32.totalorder %v980_v44, 0  ;;  %v1598_v50 = vadd.s32 4294967169, %v454_v46 }
  0xf8   : > { %v358_v49 = vsel %vm357_vm2, %v356_v42, 0  ;;  %v2041_v51 = vpop.f32.mrb[6].mxu0  ;;  %v982_v54 = vsel %vm981_vm3, %v980_v44, 0  ;;  %v2046_v56 = vpop.f32.mrb[6].mxu1 }
  0xf9   : > { %v359_v52 = vshrl.u32 %v358_v49, 5  ;;  %v360_v53 = vand.u32 31, %v358_v49  ;;  %v1670_v57 = vpop.f32.mrb[7].mxu0  ;;  %v2050_v59 = vshrl.u32 %v982_v54, 5  ;;  %v1688_v62 = vpop.f32.mrb[7].mxu1  ;;  %v984_v2 = vand.u32 31, %v982_v54 }
  0xfa   : > { %v2059_v3 = vadd.s32 1, %v1598_v50 }
  0xfb   : > { %v361_v63 = vsub.s32 32, %v360_v53  ;;  %v363_v1 = vshll.u32 %v1904_v0, %v360_v53  ;;  %v366_v5 = vshll.u32 %v1905_v4, %v360_v53  ;;  %v369_v7 = vshll.u32 %v1906_v6, %v360_v53 }
  0xfc   : > { %v372_v9 = vshll.u32 %v1907_v8, %v360_v53  ;;  %v375_v11 = vshll.u32 %v1908_v10, %v360_v53  ;;  %vm378_vm4 = vcmp.lt.s32.totalorder %v359_v52, 1  ;;  %vm380_vm5 = vcmp.lt.s32.totalorder %v359_v52, 3 }
  0xfd   : > { %v364_v12 = vshrl.u32 %v1905_v4, %v361_v63  ;;  %v367_v13 = vshrl.u32 %v1906_v6, %v361_v63  ;;  %v370_v14 = vshrl.u32 %v1907_v8, %v361_v63  ;;  %v362_v15 = vshrl.u32 %v1904_v0, %v361_v63 }
  0xfe   : > { %v373_v17 = vshrl.u32 %v1908_v10, %v361_v63  ;;  %v376_v21 = vshrl.u32 %v1909_v18, %v361_v63  ;;  %v985_v27 = vsub.s32 32, %v984_v2  ;;  %vm381_vm6 = vcmp.lt.s32.totalorder %v359_v52, 4 }
  0xff   : > { %v365_v22 = vor.u32 %v364_v12, %v363_v1  ;;  %v368_v24 = vor.u32 %v367_v13, %v366_v5  ;;  %v371_v26 = vor.u32 %v370_v14, %v369_v7  ;;  %v987_v30 = vshll.u32 %v1904_v0, %v984_v2 }
 0x100   : > { %v374_v28 = vor.u32 %v373_v17, %v372_v9  ;;  %v377_v29 = vor.u32 %v376_v21, %v375_v11  ;;  %v990_v41 = vshll.u32 %v1905_v4, %v984_v2  ;;  %vm379_vm7 = vcmp.lt.s32.totalorder %v359_v52, 2 }
 0x101   : > { %v382_v32 = vsel %vm378_vm4, %v362_v15, %v365_v22  ;;  %v383_v33 = vsel %vm381_vm6, %v371_v26, 2102212464  ;;  %v386_v34 = vsel %vm378_vm4, %v365_v22, %v368_v24  ;;  %v390_v35 = vsel %vm378_vm4, %v368_v24, %v371_v26 }
 0x102   : > { %v384_v36 = vsel %vm380_vm5, %v368_v24, %v383_v33  ;;  %v387_v37 = vsel %vm381_vm6, %v374_v28, 920167782  ;;  %v391_v38 = vsel %vm381_vm6, %v377_v29, 1326507024  ;;  %v988_v44 = vshrl.u32 %v1905_v4, %v985_v27 }
 0x103   : > { %v388_v42 = vsel %vm380_vm5, %v371_v26, %v387_v37  ;;  %v392_v43 = vsel %vm380_vm5, %v374_v28, %v391_v38  ;;  %v385_v46 = vsel %vm379_vm7, %v382_v32, %v384_v36  ;;  %v991_v49 = vshrl.u32 %v1906_v6, %v985_v27 }
 0x104   : > { %v389_v47 = vsel %vm379_vm7, %v386_v34, %v388_v42  ;;  %v393_v48 = vsel %vm379_vm7, %v390_v35, %v392_v43  ;;  %v989_v62 = vor.u32 %v988_v44, %v987_v30  ;;  %v993_v52 = vshll.u32 %v1906_v6, %v984_v2  ;;  %v2119_v44 = vpop.f32.mrb[8].mxu0 }
 0x105   : > { %v2082_v50 = vmul.u32.u64.low %v2048_v58, %v393_v48  ;;  %v2083_v53 = vmul.u32.u64.high %v2048_v58, %v393_v48, %v2082_v50  ;;  %v2086_v54 = vmul.u32.u64.low %v2048_v58, %v389_v47  ;;  %v2087_v57 = vmul.u32.u64.high %v2048_v58, %v389_v47, %v2086_v54 }
 0x106   : > { %v992_v63 = vor.u32 %v991_v49, %v990_v41  ;;  %v994_v1 = vshrl.u32 %v1907_v8, %v985_v27  ;;  %v996_v5 = vshll.u32 %v1907_v8, %v984_v2  ;;  %v997_v7 = vshrl.u32 %v1908_v10, %v985_v27  ;;  %v1673_v50 = vpop.f32.mrb[9].mxu0 }
 0x107   : > { %v999_v9 = vshll.u32 %v1908_v10, %v984_v2  ;;  %v1000_v11 = vshrl.u32 %v1909_v18, %v985_v27  ;;  %v401_v12 = vmul.u32 %v2048_v58, %v385_v46  ;;  %v986_v13 = vshrl.u32 %v1904_v0, %v985_v27 }
 0x108   : > { %v995_v14 = vor.u32 %v994_v1, %v993_v52  ;;  %vm1002_vm8 = vcmp.lt.s32.totalorder %v2050_v59, 1  ;;  %vm403_vm9 = vc.u32 %v2083_v53, %v2086_v54  ;;  %v404_v15 = vadd.s32 1, %v2087_v57 }
 0x109   : > { %v998_v17 = vor.u32 %v997_v7, %v996_v5  ;;  %vm1003_vm10 = vcmp.lt.s32.totalorder %v2050_v59, 2  ;;  %v1001_v21 = vor.u32 %v1000_v11, %v999_v9  ;;  %vm1004_vm11 = vcmp.lt.s32.totalorder %v2050_v59, 3 }
 0x10a   : > { %vm1005_vm12 = vcmp.lt.s32.totalorder %v2050_v59, 4  ;;  %v1010_v2 = vsel %vm1002_vm8, %v989_v62, %v992_v63  ;;  %v405_v58 = vsel %vm403_vm9, %v404_v15, %v2087_v57  ;;  %v1014_v26 = vsel %vm1002_vm8, %v992_v63, %v995_v14 }
 0x10b   : > { %v1007_v22 = vsel %vm1005_vm12, %v995_v14, 2102212464  ;;  %v1011_v24 = vsel %vm1005_vm12, %v998_v17, 920167782  ;;  %v406_v27 = vadd.s32 %v405_v58, %v401_v12  ;;  %v1006_v28 = vsel %vm1002_vm8, %v986_v13, %v989_v62 }
 0x10c   : > { %v1012_v29 = vsel %vm1004_vm11, %v995_v14, %v1011_v24  ;;  %v1015_v30 = vsel %vm1005_vm12, %v1001_v21, 1326507024  ;;  %v1008_v32 = vsel %vm1004_vm11, %v992_v63, %v1007_v22  ;;  %vm461_vm13 = vcmp.gt.s32.totalorder %v2059_v3, 0 }
 0x10d   : > { %v1013_v33 = vsel %vm1003_vm10, %v1010_v2, %v1012_v29  ;;  %v1016_v34 = vsel %vm1004_vm11, %v998_v17, %v1015_v30  ;;  %v407_v35 = vadd.s32 536870912, %v406_v27  ;;  %v462_v43 = vsel %vm461_vm13, %v2059_v3, 0 }
 0x10e   : > { %v1017_v36 = vsel %vm1003_vm10, %v1014_v26, %v1016_v34  ;;  %v2110_v37 = vmul.u32.u64.low %v2052_v60, %v1013_v33  ;;  %v2111_v38 = vmul.u32.u64.high %v2052_v60, %v1013_v33, %v2110_v37  ;;  %v1009_v47 = vsel %vm1003_vm10, %v1006_v28, %v1008_v32 }
 0x10f   : > { %v2115_v41 = vmul.u32.u64.low %v2052_v60, %v1017_v36  ;;  %v2116_v42 = vmul.u32.u64.high %v2052_v60, %v1017_v36, %v2115_v41  ;;  %v408_v46 = vshrl.u32 %v407_v35, 30  ;;  %v464_v48 = vand.u32 31, %v462_v43 }
 0x110   : > { %v1077_v49 = vand.u32 2139095040, %v2044_v55  ;;  %v1028_v62 = vadd.s32 1, %v2111_v38  ;;  %v458_v63 = vor.u32 8388608, %v2056_v61  ;;  %v1025_v52 = vmul.u32 %v2052_v60, %v1009_v47 }
 0x111   : > { %v409_v57 = vshll.u32 %v408_v46, 30  ;;  %vm1027_vm14 = vc.u32 %v2116_v42, %v2110_v37  ;;  %v465_v3 = vsub.s32 32, %v464_v48  ;;  %v402_v9 = vadd.s32 %v2086_v54, %v2083_v53 }
 0x112   : > { %v1029_v59 = vsel %vm1027_vm14, %v1028_v62, %v2111_v38  ;;  %v1078_v5 = vshrl.u32 %v1077_v49, 23  ;;  %v2135_v12 = vshll.u32 %v458_v63, 8  ;;  %v1074_v60 = vand.u32 2147483647, %v2044_v55 }
 0x113   : > { %v2129_v1 = vsub.s32 %v406_v27, %v409_v57  ;;  %v1030_v7 = vadd.s32 %v1029_v59, %v1025_v52  ;;  %v2138_v13 = vshrl.u32 %v462_v43, 5  ;;  %v468_v14 = vshrl.u32 %v1905_v4, %v465_v3 }
 0x114   : > { %v471_v15 = vshrl.u32 %v1906_v6, %v465_v3  ;;  %v474_v21 = vshrl.u32 %v1907_v8, %v465_v3  ;;  %v477_v2 = vshrl.u32 %v1908_v10, %v465_v3  ;;  %v2145_v53 = vadd.s32 4294967169, %v1078_v5 }
 0x115   : > { %v412_v11 = vsub.s32 0, %v2129_v1  ;;  %v1031_v61 = vadd.s32 536870912, %v1030_v7  ;;  %v432_v54 = vsub.s32 4, %v408_v46  ;;  %v467_v22 = vshll.u32 %v1904_v0, %v464_v48 }
 0x116   : > { %v470_v24 = vshll.u32 %v1905_v4, %v464_v48  ;;  %v473_v28 = vshll.u32 %v1906_v6, %v464_v48  ;;  %v476_v29 = vshll.u32 %v1907_v8, %v464_v48  ;;  %v480_v30 = vshrl.u32 %v1909_v18, %v465_v3 }
 0x117   : > { %v1595_v17 = vmin.u32 %v412_v11, %v2129_v1  ;;  %v2147_v58 = vshrl.u32 %v1031_v61, 30  ;;  %v469_v33 = vor.u32 %v468_v14, %v467_v22  ;;  %v2163_v35 = vand.u32 8388607, %v1074_v60 }
 0x118   : > { %v472_v34 = vor.u32 %v471_v15, %v470_v24  ;;  %v475_v23 = vor.u32 %v474_v21, %v473_v28  ;;  %v478_v38 = vor.u32 %v477_v2, %v476_v29  ;;  %v479_v41 = vshll.u32 %v1908_v10, %v464_v48 }
 0x119   : > { %v414_v27 = vclz %v1595_v17  ;;  %v1033_v32 = vshll.u32 %v2147_v58, 30  ;;  %v433_v43 = vsel %vm348_vm15, %v432_v54, %v408_v46  ;;  %v466_v49 = vshrl.u32 %v1904_v0, %v465_v3 }
 0x11a   : > { %vm482_vm1 = vcmp.lt.s32.totalorder %v2138_v13, 1  ;;  %v481_v50 = vor.u32 %v480_v30, %v479_v41  ;;  %vm483_vm3 = vcmp.lt.s32.totalorder %v2138_v13, 2  ;;  %vm484_vm4 = vcmp.lt.s32.totalorder %v2138_v13, 3 }
 0x11b   : > { %v1596_v36 = vadd.s32 4294967294, %v414_v27  ;;  %v2168_v47 = vsub.s32 %v1030_v7, %v1033_v32  ;;  %vm972_vm5 = vcmp.lt.s32.totalorder %v2022_v20, 0  ;;  %vm485_vm6 = vcmp.lt.s32.totalorder %v2138_v13, 4 }
 0x11c   : > { %v490_v46 = vsel %vm482_vm1, %v469_v33, %v472_v34  ;;  %v487_v52 = vsel %vm485_vm6, %v475_v23, 2102212464  ;;  %v491_v3 = vsel %vm485_vm6, %v478_v38, 920167782  ;;  %v494_v11 = vsel %vm482_vm1, %v472_v34, %v475_v23 }
 0x11d   : > { %vm1597_vm2 = vcmp.lt.s32.totalorder %v1596_v36, 0  ;;  %v1036_v48 = vsub.s32 0, %v2168_v47  ;;  %v492_v7 = vsel %vm484_vm4, %v475_v23, %v491_v3  ;;  %v495_v17 = vsel %vm485_vm6, %v481_v50, 1326507024 }
 0x11e   : > { %v417_v57 = vsel %vm1597_vm2, 0, %v1596_v36  ;;  %v493_v15 = vsel %vm483_vm3, %v490_v46, %v492_v7  ;;  %v435_v21 = vsel %vm2153_vm0, 0, %v433_v43  ;;  %vm2191_vm7 = vcmp.le.f32.partialorder %v970_v25, 0.7853982 }
 0x11f   : > { %v418_v62 = vsub.s32 32, %v417_v57  ;;  %v422_v63 = vsub.s32 4294967266, %v417_v57  ;;  %v419_v59 = vshll.u32 %v2129_v1, %v417_v57  ;;  %v1619_v5 = vmin.u32 %v1036_v48, %v2168_v47 }
 0x120   : > { %v486_v54 = vsel %vm482_vm1, %v466_v49, %v469_v33  ;;  %v1056_v27 = vsub.s32 4, %v2147_v58  ;;  %v496_v28 = vsel %vm484_vm4, %v478_v38, %v495_v17  ;;  %v439_v41 = vadd.s32 3, %v435_v21 }
 0x121   : > { %v420_v61 = vshrl.u32 %v402_v9, %v418_v62  ;;  %v423_v14 = vadd.s32 127, %v422_v63  ;;  %v1038_v2 = vclz %v1619_v5  ;;  %v488_v9 = vsel %vm484_vm4, %v472_v34, %v487_v52  ;;  %v2223_v52 = vpop.f32.mrb[8].mxu1 }
 0x122   : > { %v497_v25 = vsel %vm483_vm3, %v494_v11, %v496_v28  ;;  %v2205_v30 = vmul.u32.u64.low %v2135_v12, %v493_v15  ;;  %v2206_v32 = vmul.u32.u64.high %v2135_v12, %v493_v15, %v2205_v30  ;;  %v489_v34 = vsel %vm483_vm3, %v486_v54, %v488_v9 }
 0x123   : > { %v421_v22 = vor.u32 %v420_v61, %v419_v59  ;;  %v424_v24 = vshll.u32 %v423_v14, 23  ;;  %v1620_v29 = vadd.s32 4294967294, %v1038_v2  ;;  %v1026_v38 = vadd.s32 %v2110_v37, %v2116_v42  ;;  %v1691_v42 = vpop.f32.mrb[9].mxu1 }
 0x124   : > { %v2212_v36 = vmul.u32.u64.low %v2135_v12, %v497_v25  ;;  %v2213_v23 = vmul.u32.u64.high %v2135_v12, %v497_v25, %v2212_v36  ;;  %v1084_v43 = vadd.s32 1, %v2145_v53  ;;  %v1057_v48 = vsel %vm972_vm5, %v1056_v27, %v2147_v58 }
 0x125   : > { %v425_v33 = vor.u32 4788187, %v424_v24  ;;  %vm1621_vm8 = vcmp.lt.s32.totalorder %v1620_v29, 0  ;;  %v428_v50 = vcvt.s32.f32 %v421_v22  ;;  %v505_v62 = vmul.u32 %v2135_v12, %v489_v34 }
 0x126   : > { %v1041_v57 = vsel %vm1621_vm8, 0, %v1620_v29  ;;  %v508_v63 = vadd.s32 1, %v2206_v32  ;;  %vm507_vm9 = vc.u32 %v2213_v23, %v2205_v30  ;;  %vm1085_vm10 = vcmp.gt.s32.totalorder %v1084_v43, 0 }
 0x127   : > { %v426_v49 = vand.u32 2147483647, %v425_v33  ;;  %v1042_v13 = vsub.s32 32, %v1041_v57  ;;  %v1046_v46 = vsub.s32 4294967266, %v1041_v57  ;;  %v1043_v37 = vshll.u32 %v2168_v47, %v1041_v57 }
 0x128   : > { %v509_v58 = vsel %vm507_vm9, %v508_v63, %v2206_v32  ;;  %v1086_v5 = vsel %vm1085_vm10, %v1084_v43, 0  ;;  %v1059_v12 = vsel %vm2191_vm7, 0, %v1057_v48  ;;  %v2233_v47 = vadd.f32 %v2016_v16, %v2036_v39 }
 0x129   : > { %v429_v3 = vmul.f32 %v428_v50, %v426_v49  ;;  %v1044_v53 = vshrl.u32 %v1026_v38, %v1042_v13  ;;  %v1047_v59 = vadd.s32 127, %v1046_v46  ;;  %v510_v11 = vadd.s32 %v509_v58, %v505_v62 }
 0x12a   : > { %v1088_v61 = vand.u32 31, %v1086_v5  ;;  %v2239_v54 = vadd.f32 %v2016_v16, %v2038_v40  ;;  %v2244_v22 = vand.u32 3, %v439_v41  ;;  %v1063_v27 = vadd.s32 3, %v1059_v12 }
 0x12b   : > { %v430_v7 = vxor.u32 2147483648, %v429_v3  ;;  %v1045_v14 = vor.u32 %v1044_v53, %v1043_v37  ;;  %v1048_v15 = vshll.u32 %v1047_v59, 23  ;;  %v511_v21 = vadd.s32 536870912, %v510_v11 }
 0x12c   : > { %v1089_v2 = vsub.s32 32, %v1088_v61  ;;  %vm452_vm11 = vcmp.lt.s32.totalorder %v2031_v31, 0  ;;  %v1082_v28 = vor.u32 8388608, %v2163_v35  ;;  %v1091_v29 = vshll.u32 %v1904_v0, %v1088_v61 }
 0x12d   : > { %v431_v17 = vsel %vm348_vm15, %v430_v7, %v429_v3  ;;  %v1049_v24 = vor.u32 4788187, %v1048_v15  ;;  %v512_v39 = vshrl.u32 %v511_v21, 30  ;;  %v1052_v40 = vcvt.s32.f32 %v1045_v14 }
 0x12e   : > { %v434_v9 = vsel %vm2153_vm0, %v2019_v19, %v431_v17  ;;  %v1094_v32 = vshll.u32 %v1905_v4, %v1088_v61  ;;  %vm2252_vm12 = vcmp.le.f32.partialorder %v450_v45, 0.7853982  ;;  %v1092_v34 = vshrl.u32 %v1905_v4, %v1089_v2 }
 0x12f   : > { %1792 = vcosq.f32 %v434_v9  ;;  %v1050_v25 = vand.u32 2147483647, %v1049_v24  ;;  %v513_v33 = vshll.u32 %v512_v39, 30  ;;  %v1095_v36 = vshrl.u32 %v1906_v6, %v1089_v2 }
 0x130   : > { %1794 = vsinq.f32 %v434_v9  ;;  %v1097_v35 = vshll.u32 %v1906_v6, %v1088_v61  ;;  %v1098_v38 = vshrl.u32 %v1907_v8, %v1089_v2  ;;  %v1100_v43 = vshll.u32 %v1907_v8, %v1088_v61 }
 0x131   : > { %v1053_v41 = vmul.f32 %v1052_v40, %v1050_v25  ;;  %v1101_v49 = vshrl.u32 %v1908_v10, %v1089_v2  ;;  %vm445_vm13 = vcmp.eq.s32.totalorder %v2244_v22, 2  ;;  %v2263_v45 = vand.u32 3, %v1063_v27 }
 0x132   : > { %v2265_v50 = vsub.s32 %v510_v11, %v513_v33  ;;  %v536_v57 = vsub.s32 4, %v512_v39  ;;  %v2267_v48 = vshrl.u32 %v1086_v5, 5  ;;  %vm442_vm14 = vcmp.eq.s32.totalorder %v2244_v22, 0 }
 0x133   : > { %v1054_v13 = vxor.u32 2147483648, %v1053_v41  ;;  %v1102_v46 = vor.u32 %v1101_v49, %v1100_v43  ;;  %v1103_v62 = vshll.u32 %v1908_v10, %v1088_v61  ;;  %v1104_v63 = vshrl.u32 %v1909_v18, %v1089_v2 }
 0x134   : > { %vm441_vm15 = vcmp.lt.s32.totalorder %v2244_v22, 2  ;;  %v516_v3 = vsub.s32 0, %v2265_v50  ;;  %v1093_v37 = vor.u32 %v1092_v34, %v1091_v29  ;;  %v1096_v42 = vor.u32 %v1095_v36, %v1094_v32 }
 0x135   : > { %v557_v53 = vand.u32 2139095040, %v2233_v47  ;;  %vm438_vm0 = vweird.f32 %v2019_v19  ;;  %v1055_v59 = vsel %vm972_vm5, %v1054_v13, %v1053_v41  ;;  %v506_v58 = vadd.s32 %v2205_v30, %v2213_v23  ;;  %v2345_v19 = vpop.f32.mrb[10].mxu0 }
 0x136   : > { %v1099_v5 = vor.u32 %v1098_v38, %v1097_v35  ;;  %v2281_v7 = vshll.u32 %v1082_v28, 8  ;;  %v1058_v12 = vsel %vm2191_vm7, %v2022_v20, %v1055_v59  ;;  %v1599_v11 = vmin.u32 %v516_v3, %v2265_v50 }
 0x137   : > { %v537_v61 = vsel %vm452_vm11, %v536_v57, %v512_v39  ;;  %vm1109_vm1 = vcmp.lt.s32.totalorder %v2267_v48, 4  ;;  %1796 = vcosq.f32 %v1058_v12  ;;  %v1105_v14 = vor.u32 %v1104_v63, %v1103_v62 }
 0x138   : > { %vm1106_vm2 = vcmp.lt.s32.totalorder %v2267_v48, 1  ;;  %v1115_v30 = vsel %vm1109_vm1, %v1102_v46, 920167782  ;;  %1798 = vsinq.f32 %v1058_v12  ;;  %v518_v1 = vclz %v1599_v11 }
 0x139   : > { %v1793_v23 = vpop.eup %1792  ;;  %vm1108_vm3 = vcmp.lt.s32.totalorder %v2267_v48, 3  ;;  %v1114_v15 = vsel %vm1106_vm2, %v1093_v37, %v1096_v42  ;;  %v539_v9 = vsel %vm2252_vm12, 0, %v537_v61  ;;  %v1090_v24 = vshrl.u32 %v1904_v0, %v1089_v2 }
 0x13a   : > { %v1795_v17 = vpop.eup %1794  ;;  %v446_v21 = vxor.u32 2147483648, %v1793_v23  ;;  %v1116_v27 = vsel %vm1108_vm3, %v1099_v5, %v1115_v30  ;;  %v1600_v28 = vadd.s32 4294967294, %v518_v1  ;;  %vm1107_vm4 = vcmp.lt.s32.totalorder %v2267_v48, 2 }
 0x13b   : > { %v443_v39 = vxor.u32 2147483648, %v1795_v17  ;;  %v1111_v29 = vsel %vm1109_vm1, %v1099_v5, 2102212464  ;;  %v1117_v40 = vsel %vm1107_vm4, %v1114_v15, %v1116_v27  ;;  %v1118_v32 = vsel %vm1106_vm2, %v1096_v42, %v1099_v5  ;;  %v1676_v5 = vpop.f32.mrb[11].mxu0 }
 0x13c   : > { %v447_v25 = vsel %vm445_vm13, %v446_v21, %v1795_v17  ;;  %v1119_v2 = vsel %vm1109_vm1, %v1105_v14, 1326507024  ;;  %vm1601_vm5 = vcmp.lt.s32.totalorder %v1600_v28, 0  ;;  %v558_v36 = vshrl.u32 %v557_v53, 23 }
 0x13d   : > { %v444_v33 = vsel %vm442_vm14, %v1793_v23, %v443_v39  ;;  %v1120_v34 = vsel %vm1108_vm3, %v1102_v46, %v1119_v2  ;;  %vm1065_vm6 = vcmp.lt.s32.totalorder %v2263_v45, 2  ;;  %v521_v41 = vsel %vm1601_vm5, 0, %v1600_v28 }
 0x13e   : > { %v448_v35 = vsel %vm441_vm15, %v444_v33, %v447_v25  ;;  %v1110_v38 = vsel %vm1106_vm2, %v1090_v24, %v1093_v37  ;;  %v1121_v43 = vsel %vm1107_vm4, %v1118_v32, %v1120_v34  ;;  %vm1062_vm7 = vweird.f32 %v2022_v20 }
 0x13f   : > { %v449_v49 = vsel %vm438_vm0, nan, %v448_v35  ;;  %v522_v57 = vsub.s32 32, %v521_v41  ;;  %v526_v13 = vsub.s32 4294967266, %v521_v41  ;;  %v1112_v22 = vsel %vm1108_vm3, %v1096_v42, %v1111_v29 }
 0x140   : > { %1490 = vst [vmem:[%s2333_s10] sm:$0xff] %v449_v49  ;;  %v2337_v46 = vmul.u32.u64.low %v2281_v7, %v1121_v43  ;;  %v2338_v62 = vmul.u32.u64.high %v2281_v7, %v1121_v43, %v2337_v46  ;;  %v2341_v63 = vmul.u32.u64.low %v2281_v7, %v1117_v40  ;;  %v2342_v3 = vmul.u32.u64.high %v2281_v7, %v1117_v40, %v2341_v63 }
 0x141   : > { %v523_v37 = vshll.u32 %v2265_v50, %v521_v41  ;;  %v524_v53 = vshrl.u32 %v506_v58, %v522_v57  ;;  %v527_v59 = vadd.s32 127, %v526_v13  ;;  %v1602_v42 = vadd.s32 4294967169, %v558_v36  ;;  %v1797_v12 = vpop.eup %1796 }
 0x142   : > { %vm1066_vm8 = vcmp.eq.s32.totalorder %v2263_v45, 0  ;;  %vm1069_vm9 = vcmp.eq.s32.totalorder %v2263_v45, 2  ;;  %v1113_v11 = vsel %vm1107_vm4, %v1110_v38, %v1112_v22  ;;  %v554_v61 = vand.u32 2147483647, %v2233_v47  ;;  %v1799_v14 = vpop.eup %1798 }
 0x143   : > { %v1070_v30 = vxor.u32 2147483648, %v1797_v12  ;;  %v525_v23 = vor.u32 %v524_v53, %v523_v37  ;;  %v528_v1 = vshll.u32 %v527_v59, 23  ;;  %v564_v15 = vadd.s32 1, %v1602_v42 }
 0x144   : > { %v1067_v50 = vxor.u32 2147483648, %v1799_v14  ;;  %v543_v58 = vadd.s32 3, %v539_v9  ;;  %vm1131_vm10 = vc.u32 %v2338_v62, %v2341_v63  ;;  %v1132_v17 = vadd.s32 1, %v2342_v3 }
 0x145   : > { %v1071_v21 = vsel %vm1069_vm9, %v1070_v30, %v1799_v14  ;;  %v529_v24 = vor.u32 4788187, %v528_v1  ;;  %v1129_v48 = vmul.u32 %v2281_v7, %v1113_v11  ;;  %vm565_vm13 = vcmp.gt.s32.totalorder %v564_v15, 0 }
 0x146   : > { %v1068_v27 = vsel %vm1066_vm8, %v1797_v12, %v1067_v50  ;;  %v1133_v39 = vsel %vm1131_vm10, %v1132_v17, %v2342_v3  ;;  %v561_v28 = vand.u32 8388607, %v554_v61  ;;  %v566_v9 = vsel %vm565_vm13, %v564_v15, 0 }
 0x147   : > { %v1072_v29 = vsel %vm1065_vm6, %v1068_v27, %v1071_v21  ;;  %v530_v25 = vand.u32 2147483647, %v529_v24  ;;  %v532_v40 = vcvt.s32.f32 %v525_v23  ;;  %v1134_v32 = vadd.s32 %v1133_v39, %v1129_v48 }
 0x148   : > { %v1073_v2 = vsel %vm1062_vm7, nan, %v1072_v29  ;;  %v568_v7 = vand.u32 31, %v566_v9  ;;  %v2367_v34 = vand.u32 3, %v543_v58  ;;  %v562_v35 = vor.u32 8388608, %v561_v28 }
 0x149   : > { %1496 = vst [vmem:[%s2333_s10 + $0x30] sm:$0xff] %v1073_v2  ;;  %v533_v33 = vmul.f32 %v532_v40, %v530_v25  ;;  %v1135_v36 = vadd.s32 536870912, %v1134_v32  ;;  %v567_v41 = vshrl.u32 %v566_v9, 5  ;;  %v1181_v43 = vand.u32 2139095040, %v2239_v54 }
 0x14a   : > { %v569_v38 = vsub.s32 32, %v568_v7  ;;  %v571_v57 = vshll.u32 %v1904_v0, %v568_v7  ;;  %v574_v13 = vshll.u32 %v1905_v4, %v568_v7  ;;  %v577_v46 = vshll.u32 %v1906_v6, %v568_v7 }
 0x14b   : > { %v534_v49 = vxor.u32 2147483648, %v533_v33  ;;  %v1136_v45 = vshrl.u32 %v1135_v36, 30  ;;  %v580_v59 = vshll.u32 %v1907_v8, %v568_v7  ;;  %vm1076_vm14 = vcmp.lt.s32.totalorder %v2044_v55, 0 }
 0x14c   : > { %v572_v20 = vshrl.u32 %v1905_v4, %v569_v38  ;;  %v575_v22 = vshrl.u32 %v1906_v6, %v569_v38  ;;  %v578_v3 = vshrl.u32 %v1907_v8, %v569_v38  ;;  %v581_v42 = vshrl.u32 %v1908_v10, %v569_v38 }
 0x14d   : > { %v535_v37 = vsel %vm452_vm11, %v534_v49, %v533_v33  ;;  %v1137_v53 = vshll.u32 %v1136_v45, 30  ;;  %v1182_v1 = vshrl.u32 %v1181_v43, 23  ;;  %v583_v15 = vshll.u32 %v1908_v10, %v568_v7 }
 0x14e   : > { %v538_v5 = vsel %vm2252_vm12, %v2031_v31, %v535_v37  ;;  %v573_v12 = vor.u32 %v572_v20, %v571_v57  ;;  %v576_v11 = vor.u32 %v575_v22, %v574_v13  ;;  %v579_v14 = vor.u32 %v578_v3, %v577_v46 }
 0x14f   : > { %1800 = vcosq.f32 %v538_v5  ;;  %v2384_v30 = vsub.s32 %v1134_v32, %v1137_v53  ;;  %v582_v23 = vor.u32 %v581_v42, %v580_v59  ;;  %v584_v50 = vshrl.u32 %v1909_v18, %v569_v38 }
 0x150   : > { %1802 = vsinq.f32 %v538_v5  ;;  %vm586_vm11 = vcmp.lt.s32.totalorder %v567_v41, 1  ;;  %vm2390_vm15 = vcmp.le.f32.partialorder %v1074_v60, 0.7853982  ;;  %vm587_vm12 = vcmp.lt.s32.totalorder %v567_v41, 2 }
 0x151   : > { %v1140_v58 = vsub.s32 0, %v2384_v30  ;;  %vm588_vm0 = vcmp.lt.s32.totalorder %v567_v41, 3  ;;  %vm589_vm1 = vcmp.lt.s32.totalorder %v567_v41, 4  ;;  %v585_v17 = vor.u32 %v584_v50, %v583_v15 }
 0x152   : > { %v591_v21 = vsel %vm589_vm1, %v579_v14, 2102212464  ;;  %v594_v24 = vsel %vm586_vm11, %v573_v12, %v576_v11  ;;  %v595_v48 = vsel %vm589_vm1, %v582_v23, 920167782  ;;  %v1160_v39 = vsub.s32 4, %v1136_v45 }
 0x153   : > { %v1623_v27 = vmin.u32 %v1140_v58, %v2384_v30  ;;  %v570_v28 = vshrl.u32 %v1904_v0, %v569_v38  ;;  %v596_v60 = vsel %vm588_vm0, %v579_v14, %v595_v48  ;;  %v598_v29 = vsel %vm586_vm11, %v576_v11, %v579_v14 }
 0x154   : > { %v597_v9 = vsel %vm587_vm12, %v594_v24, %v596_v60  ;;  %v599_v25 = vsel %vm589_vm1, %v585_v17, 1326507024  ;;  %v602_v40 = vshll.u32 %v562_v35, 8  ;;  %vm545_vm2 = vcmp.lt.s32.totalorder %v2367_v34, 2 }
 0x155   : > { %v1142_v32 = vclz %v1623_v27  ;;  %v590_v2 = vsel %vm586_vm11, %v570_v28, %v573_v12  ;;  %v592_v7 = vsel %vm588_vm0, %v576_v11, %v591_v21  ;;  %vm542_vm3 = vweird.f32 %v2031_v31 }
 0x156   : > { %vm546_vm4 = vcmp.eq.s32.totalorder %v2367_v34, 0  ;;  %v600_v33 = vsel %vm588_vm0, %v582_v23, %v599_v25  ;;  %v2407_v36 = vmul.u32.u64.low %v602_v40, %v597_v9  ;;  %v2408_v38 = vmul.u32.u64.high %v602_v40, %v597_v9, %v2407_v36 }
 0x157   : > { %v1624_v43 = vadd.s32 4294967294, %v1142_v32  ;;  %v1161_v35 = vsel %vm1076_vm14, %v1160_v39, %v1136_v45  ;;  %v601_v49 = vsel %vm587_vm12, %v598_v29, %v600_v33  ;;  %v1626_v57 = vadd.s32 4294967169, %v1182_v1 }
 0x158   : > { %vm549_vm5 = vcmp.eq.s32.totalorder %v2367_v34, 2  ;;  %v593_v13 = vsel %vm587_vm12, %v590_v2, %v592_v7  ;;  %v2416_v20 = vmul.u32.u64.low %v602_v40, %v601_v49  ;;  %v2417_v22 = vmul.u32.u64.high %v602_v40, %v601_v49, %v2416_v20 }
 0x159   : > { %v1801_v46 = vpop.eup %1800  ;;  %v1130_v3 = vadd.s32 %v2341_v63, %v2338_v62  ;;  %vm1625_vm6 = vcmp.lt.s32.totalorder %v1624_v43, 0  ;;  %v1178_v37 = vand.u32 2147483647, %v2239_v54  ;;  %v1188_v53 = vadd.s32 1, %v1626_v57 }
 0x15a   : > { %v1803_v59 = vpop.eup %1802  ;;  %v550_v45 = vxor.u32 2147483648, %v1801_v46  ;;  %v1145_v42 = vsel %vm1625_vm6, 0, %v1624_v43  ;;  %v1163_v5 = vsel %vm2390_vm15, 0, %v1161_v35  ;;  %v612_v41 = vadd.s32 1, %v2408_v38 }
 0x15b   : > { %v547_v12 = vxor.u32 2147483648, %v1803_v59  ;;  %v1146_v11 = vsub.s32 32, %v1145_v42  ;;  %v1150_v14 = vsub.s32 4294967266, %v1145_v42  ;;  %v609_v23 = vmul.u32 %v602_v40, %v593_v13 }
 0x15c   : > { %v551_v62 = vsel %vm549_vm5, %v550_v45, %v1803_v59  ;;  %v1147_v63 = vshll.u32 %v2384_v30, %v1145_v42  ;;  %vm611_vm7 = vc.u32 %v2417_v22, %v2407_v36  ;;  %vm1189_vm8 = vcmp.gt.s32.totalorder %v1188_v53, 0 }
 0x15d   : > { %v548_v1 = vsel %vm546_vm4, %v1801_v46, %v547_v12  ;;  %v1148_v15 = vshrl.u32 %v1130_v3, %v1146_v11  ;;  %v1151_v50 = vadd.s32 127, %v1150_v14  ;;  %v613_v58 = vsel %vm611_vm7, %v612_v41, %v2408_v38 }
 0x15e   : > { %v552_v17 = vsel %vm545_vm2, %v548_v1, %v551_v62  ;;  %v614_v21 = vadd.s32 %v613_v58, %v609_v23  ;;  %v1185_v24 = vand.u32 8388607, %v1178_v37  ;;  %v1190_v48 = vsel %vm1189_vm8, %v1188_v53, 0 }
 0x15f   : > { %v553_v30 = vsel %vm542_vm3, nan, %v552_v17  ;;  %v1149_v27 = vor.u32 %v1148_v15, %v1147_v63  ;;  %v1152_v39 = vshll.u32 %v1151_v50, 23  ;;  %v1192_v60 = vand.u32 31, %v1190_v48 }
 0x160   : > { %1491 = vst [vmem:[%s2333_s10 + $0x8] sm:$0xff] %v553_v30  ;;  %v615_v28 = vadd.s32 536870912, %v614_v21  ;;  %v1167_v29 = vadd.s32 3, %v1163_v5  ;;  %v1186_v34 = vor.u32 8388608, %v1185_v24  ;;  %v1191_v43 = vshrl.u32 %v1190_v48, 5 }
 0x161   : > { %v1153_v9 = vor.u32 4788187, %v1152_v39  ;;  %v1156_v25 = vcvt.s32.f32 %v1149_v27  ;;  %v1193_v32 = vsub.s32 32, %v1192_v60  ;;  %v1195_v7 = vshll.u32 %v1904_v0, %v1192_v60 }
 0x162   : > { %v2440_v40 = vshrl.u32 %v615_v28, 30  ;;  %v1198_v33 = vshll.u32 %v1905_v4, %v1192_v60  ;;  %v1201_v31 = vshll.u32 %v1906_v6, %v1192_v60  ;;  %v1204_v49 = vshll.u32 %v1907_v8, %v1192_v60 }
 0x163   : > { %v1154_v2 = vand.u32 2147483647, %v1153_v9  ;;  %v1196_v35 = vshrl.u32 %v1905_v4, %v1193_v32  ;;  %v1199_v13 = vshrl.u32 %v1906_v6, %v1193_v32  ;;  %v1202_v20 = vshrl.u32 %v1907_v8, %v1193_v32 }
 0x164   : > { %v617_v38 = vshll.u32 %v2440_v40, 30  ;;  %v1205_v46 = vshrl.u32 %v1908_v10, %v1193_v32  ;;  %v1207_v53 = vshll.u32 %v1908_v10, %v1192_v60  ;;  %v1208_v59 = vshrl.u32 %v1909_v18, %v1193_v32 }
 0x165   : > { %v1157_v57 = vmul.f32 %v1156_v25, %v1154_v2  ;;  %v1197_v42 = vor.u32 %v1196_v35, %v1195_v7  ;;  %v1200_v5 = vor.u32 %v1199_v13, %v1198_v33  ;;  %v1203_v41 = vor.u32 %v1202_v20, %v1201_v31 }
 0x166   : > { %v2451_v3 = vsub.s32 %v614_v21, %v617_v38  ;;  %v2455_v12 = vand.u32 3, %v1167_v29  ;;  %v1206_v14 = vor.u32 %v1205_v46, %v1204_v49  ;;  %v2460_v23 = vadd.f32 %v2016_v16, %v2041_v51 }
 0x167   : > { %v1158_v45 = vxor.u32 2147483648, %v1157_v57  ;;  %vm556_vm9 = vcmp.lt.s32.totalorder %v2233_v47, 0  ;;  %v1194_v63 = vshrl.u32 %v1904_v0, %v1193_v32  ;;  %vm1210_vm10 = vcmp.lt.s32.totalorder %v1191_v43, 1 }
 0x168   : > { %v620_v11 = vsub.s32 0, %v2451_v3  ;;  %v1226_v1 = vshll.u32 %v1186_v34, 8  ;;  %v1209_v58 = vor.u32 %v1208_v59, %v1207_v53  ;;  %vm1213_vm13 = vcmp.lt.s32.totalorder %v1191_v43, 4 }
 0x169   : > { %v1159_v62 = vsel %vm1076_vm14, %v1158_v45, %v1157_v57  ;;  %v1215_v16 = vsel %vm1213_vm13, %v1203_v41, 2102212464  ;;  %v1218_v51 = vsel %vm1210_vm10, %v1197_v42, %v1200_v5  ;;  %v1219_v17 = vsel %vm1213_vm13, %v1206_v14, 920167782 }
 0x16a   : > { %v1162_v15 = vsel %vm2390_vm15, %v2044_v55, %v1159_v62  ;;  %v1603_v50 = vmin.u32 %v620_v11, %v2451_v3  ;;  %vm1211_vm14 = vcmp.lt.s32.totalorder %v1191_v43, 2  ;;  %vm1212_vm11 = vcmp.lt.s32.totalorder %v1191_v43, 3 }
 0x16b   : > { %1804 = vcosq.f32 %v1162_v15  ;;  %v640_v24 = vsub.s32 4, %v2440_v40  ;;  %v1214_v26 = vsel %vm1210_vm10, %v1194_v63, %v1197_v42  ;;  %v1220_v48 = vsel %vm1212_vm11, %v1203_v41, %v1219_v17 }
 0x16c   : > { %1806 = vsinq.f32 %v1162_v15  ;;  %v622_v21 = vclz %v1603_v50  ;;  %v1222_v30 = vsel %vm1210_vm10, %v1200_v5, %v1203_v41  ;;  %v1216_v39 = vsel %vm1212_vm11, %v1200_v5, %v1215_v16  ;;  %v2513_v15 = vld [vmem:[%s2940_s2] ss:$0 sm:$0xff] }
 0x16d   : > { %v1221_v28 = vsel %vm1211_vm14, %v1218_v51, %v1220_v48  ;;  %v1223_v60 = vsel %vm1213_vm13, %v1209_v58, 1326507024  ;;  %v661_v34 = vand.u32 2139095040, %v2460_v23  ;;  %vm2485_vm15 = vcmp.le.f32.partialorder %v554_v61, 0.7853982 }
 0x16e   : > { %v1604_v27 = vadd.s32 4294967294, %v622_v21  ;;  %v1224_v9 = vsel %vm1212_vm11, %v1206_v14, %v1223_v60  ;;  %v2478_v29 = vmul.u32.u64.low %v1226_v1, %v1221_v28  ;;  %v2479_v25 = vmul.u32.u64.high %v1226_v1, %v1221_v28, %v2478_v29 }
 0x16f   : > { %v610_v2 = vadd.s32 %v2407_v36, %v2417_v22  ;;  %v1225_v7 = vsel %vm1211_vm14, %v1222_v30, %v1224_v9  ;;  %vm1169_vm0 = vcmp.lt.s32.totalorder %v2455_v12, 2  ;;  %v662_v35 = vshrl.u32 %v661_v34, 23 }
 0x170   : > { %vm1605_vm12 = vcmp.lt.s32.totalorder %v1604_v27, 0  ;;  %v2493_v31 = vmul.u32.u64.low %v1226_v1, %v1225_v7  ;;  %v2494_v38 = vmul.u32.u64.high %v1226_v1, %v1225_v7, %v2493_v31  ;;  %v641_v61 = vsel %vm556_vm9, %v640_v24, %v2440_v40 }
 0x171   : > { %v625_v33 = vsel %vm1605_vm12, 0, %v1604_v27  ;;  %v1217_v13 = vsel %vm1211_vm14, %v1214_v26, %v1216_v39  ;;  %vm1170_vm1 = vcmp.eq.s32.totalorder %v2455_v12, 0  ;;  %vm1173_vm2 = vcmp.eq.s32.totalorder %v2455_v12, 2 }
 0x172   : > { %v626_v49 = vsub.s32 32, %v625_v33  ;;  %v630_v57 = vsub.s32 4294967266, %v625_v33  ;;  %v1236_v36 = vadd.s32 1, %v2479_v25  ;;  %v1606_v22 = vadd.s32 4294967169, %v662_v35 }
 0x173   : > { %v627_v20 = vshll.u32 %v2451_v3, %v625_v33  ;;  %v658_v59 = vand.u32 2147483647, %v2460_v23  ;;  %v643_v42 = vsel %vm2485_vm15, 0, %v641_v61  ;;  %v1233_v40 = vmul.u32 %v1226_v1, %v1217_v13 }
 0x174   : > { %v628_v46 = vshrl.u32 %v610_v2, %v626_v49  ;;  %v631_v53 = vadd.s32 127, %v630_v57  ;;  %vm1235_vm3 = vc.u32 %v2494_v38, %v2478_v29  ;;  %v668_v43 = vadd.s32 1, %v1606_v22 }
 0x175   : > { %v1805_v45 = vpop.eup %1804  ;;  %v1237_v62 = vsel %vm1235_vm3, %v1236_v36, %v2479_v25  ;;  %v2517_v1 = vadd.f32 %v2513_v15, %v2046_v56  ;;  %v647_v16 = vadd.s32 3, %v643_v42  ;;  %v665_v24 = vand.u32 8388607, %v658_v59 }
 0x176   : > { %v1807_v5 = vpop.eup %1806  ;;  %v1174_v41 = vxor.u32 2147483648, %v1805_v45  ;;  %v629_v11 = vor.u32 %v628_v46, %v627_v20  ;;  %v632_v14 = vshll.u32 %v631_v53, 23  ;;  %v1238_v63 = vadd.s32 %v1237_v62, %v1233_v40 }
 0x177   : > { %v1171_v3 = vxor.u32 2147483648, %v1807_v5  ;;  %vm669_vm4 = vcmp.gt.s32.totalorder %v668_v43, 0  ;;  %vm1166_vm5 = vweird.f32 %v2044_v55  ;;  %v1285_v60 = vand.u32 2139095040, %v2517_v1 }
 0x178   : > { %v1175_v50 = vsel %vm1173_vm2, %v1174_v41, %v1807_v5  ;;  %v633_v58 = vor.u32 4788187, %v632_v14  ;;  %v670_v51 = vsel %vm669_vm4, %v668_v43, 0  ;;  %v1239_v21 = vadd.s32 536870912, %v1238_v63 }
 0x179   : > { %v1172_v17 = vsel %vm1170_vm1, %v1805_v45, %v1171_v3  ;;  %v672_v26 = vand.u32 31, %v670_v51  ;;  %v636_v30 = vcvt.s32.f32 %v629_v11  ;;  %v2530_v25 = vand.u32 3, %v647_v16 }
 0x17a   : > { %v1176_v56 = vsel %vm1169_vm0, %v1172_v17, %v1175_v50  ;;  %v634_v48 = vand.u32 2147483647, %v633_v58  ;;  %v1240_v39 = vshrl.u32 %v1239_v21, 30  ;;  %v666_v2 = vor.u32 8388608, %v665_v24 }
 0x17b   : > { %v1177_v27 = vsel %vm1166_vm5, nan, %v1176_v56  ;;  %v673_v28 = vsub.s32 32, %v672_v26  ;;  %v675_v7 = vshll.u32 %v1904_v0, %v672_v26  ;;  %vm1180_vm6 = vcmp.lt.s32.totalorder %v2239_v54, 0 }
 0x17c   : > { %1497 = vst [vmem:[%s2333_s10 + $0x38] sm:$0xff] %v1177_v27  ;;  %v637_v9 = vmul.f32 %v636_v30, %v634_v48  ;;  %v1241_v34 = vshll.u32 %v1240_v39, 30  ;;  %v671_v57 = vshrl.u32 %v670_v51, 5  ;;  %v678_v61 = vshll.u32 %v1905_v4, %v672_v26 }
 0x17d   : > { %v676_v55 = vshrl.u32 %v1905_v4, %v673_v28  ;;  %v679_v12 = vshrl.u32 %v1906_v6, %v673_v28  ;;  %v682_v31 = vshrl.u32 %v1907_v8, %v673_v28  ;;  %v685_v35 = vshrl.u32 %v1908_v10, %v673_v28 }
 0x17e   : > { %v638_v33 = vxor.u32 2147483648, %v637_v9  ;;  %v2538_v49 = vsub.s32 %v1238_v63, %v1241_v34  ;;  %v1286_v13 = vshrl.u32 %v1285_v60, 23  ;;  %v681_v20 = vshll.u32 %v1906_v6, %v672_v26 }
 0x17f   : > { %v677_v22 = vor.u32 %v676_v55, %v675_v7  ;;  %v684_v46 = vshll.u32 %v1907_v8, %v672_v26  ;;  %v680_v42 = vor.u32 %v679_v12, %v678_v61  ;;  %v687_v40 = vshll.u32 %v1908_v10, %v672_v26 }
 0x180   : > { %v639_v36 = vsel %vm556_vm9, %v638_v33, %v637_v9  ;;  %v1244_v45 = vsub.s32 0, %v2538_v49  ;;  %v683_v43 = vor.u32 %v682_v31, %v681_v20  ;;  %v688_v41 = vshrl.u32 %v1909_v18, %v673_v28 }
 0x181   : > { %v642_v53 = vsel %vm2485_vm15, %v2233_v47, %v639_v36  ;;  %v686_v5 = vor.u32 %v685_v35, %v684_v46  ;;  %vm2553_vm7 = vcmp.le.f32.partialorder %v1178_v37, 0.7853982  ;;  %v706_v14 = vshll.u32 %v666_v2, 8 }
 0x182   : > { %1808 = vcosq.f32 %v642_v53  ;;  %v1627_v32 = vmin.u32 %v1244_v45, %v2538_v49  ;;  %v1630_v62 = vadd.s32 4294967169, %v1286_v13  ;;  %v1264_v3 = vsub.s32 4, %v1240_v39 }
 0x183   : > { %1810 = vsinq.f32 %v642_v53  ;;  %v674_v63 = vshrl.u32 %v1904_v0, %v673_v28  ;;  %v689_v50 = vor.u32 %v688_v41, %v687_v40  ;;  %vm690_vm8 = vcmp.lt.s32.totalorder %v671_v57, 1 }
 0x184   : > { %v1246_v58 = vclz %v1627_v32  ;;  %vm692_vm9 = vcmp.lt.s32.totalorder %v671_v57, 3  ;;  %vm693_vm10 = vcmp.lt.s32.totalorder %v671_v57, 4  ;;  %v698_v16 = vsel %vm690_vm8, %v677_v22, %v680_v42 }
 0x185   : > { %v695_v51 = vsel %vm693_vm10, %v683_v43, 2102212464  ;;  %v699_v17 = vsel %vm693_vm10, %v686_v5, 920167782  ;;  %v702_v21 = vsel %vm690_vm8, %v680_v42, %v683_v43  ;;  %v703_v37 = vsel %vm693_vm10, %v689_v50, 1326507024 }
 0x186   : > { %v1628_v24 = vadd.s32 4294967294, %v1246_v58  ;;  %vm691_vm13 = vcmp.lt.s32.totalorder %v671_v57, 2  ;;  %v700_v26 = vsel %vm692_vm9, %v683_v43, %v699_v17  ;;  %v704_v56 = vsel %vm692_vm9, %v686_v5, %v703_v37 }
 0x187   : > { %vm649_vm14 = vcmp.lt.s32.totalorder %v2530_v25, 2  ;;  %v1265_v48 = vsel %vm1180_vm6, %v1264_v3, %v1240_v39  ;;  %v694_v30 = vsel %vm690_vm8, %v674_v63, %v677_v22  ;;  %v701_v27 = vsel %vm691_vm13, %v698_v16, %v700_v26 }
 0x188   : > { %v705_v28 = vsel %vm691_vm13, %v702_v21, %v704_v56  ;;  %vm646_vm11 = vweird.f32 %v2233_v47  ;;  %vm1629_vm15 = vcmp.lt.s32.totalorder %v1628_v24, 0  ;;  %v696_v60 = vsel %vm692_vm9, %v680_v42, %v695_v51 }
 0x189   : > { %v2568_v9 = vmul.u32.u64.low %v706_v14, %v705_v28  ;;  %v2569_v34 = vmul.u32.u64.high %v706_v14, %v705_v28, %v2568_v9  ;;  %v1249_v2 = vsel %vm1629_vm15, 0, %v1628_v24  ;;  %v1292_v33 = vadd.s32 1, %v1630_v62 }
 0x18a   : > { %v2571_v7 = vmul.u32.u64.low %v706_v14, %v701_v27  ;;  %v2572_v55 = vmul.u32.u64.high %v706_v14, %v701_v27, %v2571_v7  ;;  %vm650_vm12 = vcmp.eq.s32.totalorder %v2530_v25, 0  ;;  %v1234_v39 = vadd.s32 %v2478_v29, %v2494_v38 }
 0x18b   : > { %v1250_v12 = vsub.s32 32, %v1249_v2  ;;  %v1254_v31 = vsub.s32 4294967266, %v1249_v2  ;;  %vm653_vm0 = vcmp.eq.s32.totalorder %v2530_v25, 2  ;;  %v1267_v61 = vsel %vm2553_vm7, 0, %v1265_v48 }
 0x18c   : > { %v1809_v35 = vpop.eup %1808  ;;  %v697_v13 = vsel %vm691_vm13, %v694_v30, %v696_v60  ;;  %vm1293_vm1 = vcmp.gt.s32.totalorder %v1292_v33, 0  ;;  %v1251_v20 = vshll.u32 %v2538_v49, %v1249_v2  ;;  %vm715_vm2 = vc.u32 %v2569_v34, %v2571_v7 }
 0x18d   : > { %v1811_v36 = vpop.eup %1810  ;;  %v654_v22 = vxor.u32 2147483648, %v1809_v35  ;;  %v1252_v46 = vshrl.u32 %v1234_v39, %v1250_v12  ;;  %v1255_v53 = vadd.s32 127, %v1254_v31  ;;  %v716_v29 = vadd.s32 1, %v2572_v55 }
 0x18e   : > { %v651_v45 = vxor.u32 2147483648, %v1811_v36  ;;  %v1294_v38 = vsel %vm1293_vm1, %v1292_v33, 0  ;;  %v713_v57 = vmul.u32 %v706_v14, %v697_v13  ;;  %v1282_v49 = vand.u32 2147483647, %v2517_v1 }
 0x18f   : > { %v655_v42 = vsel %vm653_vm0, %v654_v22, %v1811_v36  ;;  %v1253_v40 = vor.u32 %v1252_v46, %v1251_v20  ;;  %v1256_v43 = vshll.u32 %v1255_v53, 23  ;;  %v717_v41 = vsel %vm715_vm2, %v716_v29, %v2572_v55 }
 0x190   : > { %v652_v5 = vsel %vm650_vm12, %v1809_v35, %v651_v45  ;;  %v1296_v32 = vand.u32 31, %v1294_v38  ;;  %v1271_v63 = vadd.s32 3, %v1267_v61  ;;  %v718_v50 = vadd.s32 %v717_v41, %v713_v57 }
 0x191   : > { %v656_v62 = vsel %vm649_vm14, %v652_v5, %v655_v42  ;;  %v1257_v3 = vor.u32 4788187, %v1256_v43  ;;  %v1260_v16 = vcvt.s32.f32 %v1253_v40  ;;  %v1289_v27 = vand.u32 8388607, %v1282_v49 }
 0x192   : > { %v657_v58 = vsel %vm646_vm11, nan, %v656_v62  ;;  %v1297_v51 = vsub.s32 32, %v1296_v32  ;;  %v1299_v14 = vshll.u32 %v1904_v0, %v1296_v32  ;;  %v719_v21 = vadd.s32 536870912, %v718_v50 }
 0x193   : > { %1492 = vst [vmem:[%s2333_s10 + $0x10] sm:$0xff] %v657_v58  ;;  %v1258_v17 = vand.u32 2147483647, %v1257_v3  ;;  %v1302_v37 = vshll.u32 %v1905_v4, %v1296_v32  ;;  %v1305_v24 = vshll.u32 %v1906_v6, %v1296_v32  ;;  %v1308_v47 = vshll.u32 %v1907_v8, %v1296_v32 }
 0x194   : > { %v1300_v25 = vshrl.u32 %v1905_v4, %v1297_v51  ;;  %v1303_v26 = vshrl.u32 %v1906_v6, %v1297_v51  ;;  %v1306_v56 = vshrl.u32 %v1907_v8, %v1297_v51  ;;  %v720_v30 = vshrl.u32 %v719_v21, 30 }
 0x195   : > { %v1261_v48 = vmul.f32 %v1260_v16, %v1258_v17  ;;  %v1309_v28 = vshrl.u32 %v1908_v10, %v1297_v51  ;;  %v1295_v60 = vshrl.u32 %v1294_v38, 5  ;;  %v1311_v9 = vshll.u32 %v1908_v10, %v1296_v32 }
 0x196   : > { %v1312_v2 = vshrl.u32 %v1909_v18, %v1297_v51  ;;  %v2607_v33 = vand.u32 3, %v1271_v63  ;;  %v721_v39 = vshll.u32 %v720_v30, 30  ;;  %v1301_v12 = vor.u32 %v1300_v25, %v1299_v14 }
 0x197   : > { %v1262_v55 = vxor.u32 2147483648, %v1261_v48  ;;  %v1304_v31 = vor.u32 %v1303_v26, %v1302_v37  ;;  %v1307_v35 = vor.u32 %v1306_v56, %v1305_v24  ;;  %v1310_v61 = vor.u32 %v1309_v28, %v1308_v47 }
 0x198   : > { %v2611_v36 = vsub.s32 %v718_v50, %v721_v39  ;;  %v1290_v22 = vor.u32 8388608, %v1289_v27  ;;  %v2615_v20 = vadd.f32 %v2513_v15, %v2119_v44  ;;  %v1298_v53 = vshrl.u32 %v1904_v0, %v1297_v51 }
 0x199   : > { %v1263_v13 = vsel %vm1180_vm6, %v1262_v55, %v1261_v48  ;;  %v1313_v45 = vor.u32 %v1312_v2, %v1311_v9  ;;  %vm1314_vm3 = vcmp.lt.s32.totalorder %v1295_v60, 1  ;;  %vm2623_vm4 = vcmp.le.f32.partialorder %v658_v59, 0.7853982 }
 0x19a   : > { %v1266_v46 = vsel %vm2553_vm7, %v2239_v54, %v1263_v13  ;;  %v724_v38 = vsub.s32 0, %v2611_v36  ;;  %vm1316_vm5 = vcmp.lt.s32.totalorder %v1295_v60, 3  ;;  %vm1317_vm6 = vcmp.lt.s32.totalorder %v1295_v60, 4 }
 0x19b   : > { %1812 = vcosq.f32 %v1266_v46  ;;  %v1319_v44 = vsel %vm1317_vm6, %v1307_v35, 2102212464  ;;  %v1322_v11 = vsel %vm1314_vm3, %v1301_v12, %v1304_v31  ;;  %v1323_v42 = vsel %vm1317_vm6, %v1310_v61, 920167782 }
 0x19c   : > { %1814 = vsinq.f32 %v1266_v46  ;;  %v1607_v40 = vmin.u32 %v724_v38, %v2611_v36  ;;  %v744_v43 = vsub.s32 4, %v720_v30  ;;  %vm1315_vm7 = vcmp.lt.s32.totalorder %v1295_v60, 2 }
 0x19d   : > { %v1324_v57 = vsel %vm1316_vm5, %v1307_v35, %v1323_v42  ;;  %v1326_v5 = vsel %vm1314_vm3, %v1304_v31, %v1307_v35  ;;  %v1327_v41 = vsel %vm1317_vm6, %v1313_v45, 1326507024  ;;  %v1330_v32 = vshll.u32 %v1290_v22, 8 }
 0x19e   : > { %v1325_v59 = vsel %vm1315_vm7, %v1322_v11, %v1324_v57  ;;  %vm660_vm8 = vcmp.lt.s32.totalorder %v2460_v23, 0  ;;  %v726_v62 = vclz %v1607_v40  ;;  %v1318_v3 = vsel %vm1314_vm3, %v1298_v53, %v1301_v12 }
 0x19f   : > { %v1320_v63 = vsel %vm1316_vm5, %v1304_v31, %v1319_v44  ;;  %vm1274_vm9 = vcmp.eq.s32.totalorder %v2607_v33, 0  ;;  %v1328_v50 = vsel %vm1316_vm5, %v1310_v61, %v1327_v41  ;;  %v745_v14 = vsel %vm660_vm8, %v744_v43, %v720_v30 }
 0x1a0   : > { %v2638_v58 = vmul.u32.u64.low %v1330_v32, %v1325_v59  ;;  %v2639_v16 = vmul.u32.u64.high %v1330_v32, %v1325_v59, %v2638_v58  ;;  %v1608_v51 = vadd.s32 4294967294, %v726_v62  ;;  %v1329_v17 = vsel %vm1315_vm7, %v1326_v5, %v1328_v50 }
 0x1a1   : > { %v765_v21 = vand.u32 2139095040, %v2615_v20  ;;  %vm1270_vm10 = vweird.f32 %v2239_v54  ;;  %v1321_v37 = vsel %vm1315_vm7, %v1318_v3, %v1320_v63  ;;  %v762_v26 = vand.u32 2147483647, %v2615_v20 }
 0x1a2   : > { %v2647_v24 = vmul.u32.u64.low %v1330_v32, %v1329_v17  ;;  %v2648_v25 = vmul.u32.u64.high %v1330_v32, %v1329_v17, %v2647_v24  ;;  %vm1277_vm13 = vcmp.eq.s32.totalorder %v2607_v33, 2  ;;  %vm1609_vm14 = vcmp.lt.s32.totalorder %v1608_v51, 0 }
 0x1a3   : > { %v766_v56 = vshrl.u32 %v765_v21, 23  ;;  %v2654_v47 = vadd.f32 %v2513_v15, %v2223_v52  ;;  %v714_v48 = vadd.s32 %v2571_v7, %v2569_v34  ;;  %v729_v30 = vsel %vm1609_vm14, 0, %v1608_v51 }
 0x1a4   : > { %v747_v27 = vsel %vm2623_vm4, 0, %v745_v14  ;;  %v1340_v28 = vadd.s32 1, %v2639_v16  ;;  %v730_v9 = vsub.s32 32, %v729_v30  ;;  %v734_v2 = vsub.s32 4294967266, %v729_v30 }
 0x1a5   : > { %v1813_v60 = vpop.eup %1812  ;;  %v1337_v55 = vmul.u32 %v1330_v32, %v1321_v37  ;;  %v1610_v39 = vadd.s32 4294967169, %v766_v56  ;;  %v731_v35 = vshll.u32 %v2611_v36, %v729_v30  ;;  %vm1339_vm11 = vc.u32 %v2648_v25, %v2638_v58 }
 0x1a6   : > { %v1815_v12 = vpop.eup %1814  ;;  %v1278_v31 = vxor.u32 2147483648, %v1813_v60  ;;  %v769_v52 = vand.u32 8388607, %v762_v26  ;;  %v732_v7 = vshrl.u32 %v714_v48, %v730_v9  ;;  %v735_v61 = vadd.s32 127, %v734_v2 }
 0x1a7   : > { %v1275_v34 = vxor.u32 2147483648, %v1815_v12  ;;  %v1341_v13 = vsel %vm1339_vm11, %v1340_v28, %v2639_v16  ;;  %v772_v53 = vadd.s32 1, %v1610_v39  ;;  %v1389_v45 = vand.u32 2139095040, %v2654_v47 }
 0x1a8   : > { %v1279_v22 = vsel %vm1277_vm13, %v1278_v31, %v1815_v12  ;;  %v1342_v46 = vadd.s32 %v1341_v13, %v1337_v55  ;;  %vm1273_vm15 = vcmp.lt.s32.totalorder %v2607_v33, 2  ;;  %v733_v38 = vor.u32 %v732_v7, %v731_v35 }
 0x1a9   : > { %v1276_v36 = vsel %vm1274_vm9, %v1813_v60, %v1275_v34  ;;  %v736_v44 = vshll.u32 %v735_v61, 23  ;;  %v751_v42 = vadd.s32 3, %v747_v27  ;;  %vm773_vm12 = vcmp.gt.s32.totalorder %v772_v53, 0 }
 0x1aa   : > { %v1280_v11 = vsel %vm1273_vm15, %v1276_v36, %v1279_v22  ;;  %v1343_v40 = vadd.s32 536870912, %v1342_v46  ;;  %v770_v59 = vor.u32 8388608, %v769_v52  ;;  %v774_v5 = vsel %vm773_vm12, %v772_v53, 0 }
 0x1ab   : > { %v1281_v43 = vsel %vm1270_vm10, nan, %v1280_v11  ;;  %v737_v57 = vor.u32 4788187, %v736_v44  ;;  %v776_v32 = vand.u32 31, %v774_v5  ;;  %v1390_v62 = vshrl.u32 %v1389_v45, 23 }
 0x1ac   : > { %1498 = vst [vmem:[%s2333_s10 + $0x40] sm:$0xff] %v1281_v43  ;;  %v1344_v41 = vshrl.u32 %v1343_v40, 30  ;;  %v740_v63 = vcvt.s32.f32 %v733_v38  ;;  %v2675_v33 = vand.u32 3, %v751_v42  ;;  %vm1284_vm0 = vcmp.lt.s32.totalorder %v2517_v1, 0 }
 0x1ad   : > { %v738_v3 = vand.u32 2147483647, %v737_v57  ;;  %v777_v16 = vsub.s32 32, %v776_v32  ;;  %v1338_v14 = vadd.s32 %v2638_v58, %v2648_v25  ;;  %v2679_v54 = vshll.u32 %v770_v59, 8 }
 0x1ae   : > { %v1345_v50 = vshll.u32 %v1344_v41, 30  ;;  %v1386_v17 = vand.u32 2147483647, %v2654_v47  ;;  %v2684_v37 = vshrl.u32 %v774_v5, 5  ;;  %v1634_v56 = vadd.s32 4294967169, %v1390_v62 }
 0x1af   : > { %v741_v51 = vmul.f32 %v740_v63, %v738_v3  ;;  %v780_v24 = vshrl.u32 %v1905_v4, %v777_v16  ;;  %v779_v30 = vshll.u32 %v1904_v0, %v776_v32  ;;  %v783_v27 = vshrl.u32 %v1906_v6, %v777_v16 }
 0x1b0   : > { %v2682_v21 = vsub.s32 %v1342_v46, %v1345_v50  ;;  %v786_v28 = vshrl.u32 %v1907_v8, %v777_v16  ;;  %v782_v25 = vshll.u32 %v1905_v4, %v776_v32  ;;  %v785_v60 = vshll.u32 %v1906_v6, %v776_v32 }
 0x1b1   : > { %v742_v48 = vxor.u32 2147483648, %v741_v51  ;;  %v789_v9 = vshrl.u32 %v1908_v10, %v777_v16  ;;  %v1368_v55 = vsub.s32 4, %v1344_v41  ;;  %v781_v39 = vor.u32 %v780_v24, %v779_v30 }
 0x1b2   : > { %v1348_v58 = vsub.s32 0, %v2682_v21  ;;  %v788_v12 = vshll.u32 %v1907_v8, %v776_v32  ;;  %v784_v52 = vor.u32 %v783_v27, %v782_v25  ;;  %v787_v34 = vor.u32 %v786_v28, %v785_v60 }
 0x1b3   : > { %v743_v2 = vsel %vm660_vm8, %v742_v48, %v741_v51  ;;  %v791_v61 = vshll.u32 %v1908_v10, %v776_v32  ;;  %v792_v13 = vshrl.u32 %v1909_v18, %v777_v16  ;;  %v2705_v46 = vand.u32 8388607, %v1386_v17 }
 0x1b4   : > { %v746_v31 = vsel %vm2623_vm4, %v2460_v23, %v743_v2  ;;  %v1631_v35 = vmin.u32 %v1348_v58, %v2682_v21  ;;  %v790_v7 = vor.u32 %v789_v9, %v788_v12  ;;  %v1396_v53 = vadd.s32 1, %v1634_v56 }
 0x1b5   : > { %1816 = vcosq.f32 %v746_v31  ;;  %v2709_v29 = vsel %vm1284_vm0, %v1368_v55, %v1344_v41  ;;  %v778_v45 = vshrl.u32 %v1904_v0, %v777_v16  ;;  %v793_v36 = vor.u32 %v792_v13, %v791_v61 }
 0x1b6   : > { %1818 = vsinq.f32 %v746_v31  ;;  %v1350_v22 = vclz %v1631_v35  ;;  %vm794_vm1 = vcmp.lt.s32.totalorder %v2684_v37, 1  ;;  %vm2715_vm2 = vcmp.le.f32.partialorder %v1282_v49, 0.7853982 }
 0x1b7   : > { %vm796_vm3 = vcmp.lt.s32.totalorder %v2684_v37, 3  ;;  %vm797_vm4 = vcmp.lt.s32.totalorder %v2684_v37, 4  ;;  %v802_v11 = vsel %vm794_vm1, %v781_v39, %v784_v52  ;;  %v806_v43 = vsel %vm794_vm1, %v784_v52, %v787_v34 }
 0x1b8   : > { %v1632_v44 = vadd.s32 4294967294, %v1350_v22  ;;  %v799_v42 = vsel %vm797_vm4, %v787_v34, 2102212464  ;;  %v803_v40 = vsel %vm797_vm4, %v790_v7, 920167782  ;;  %vm795_vm6 = vcmp.lt.s32.totalorder %v2684_v37, 2 }
 0x1b9   : > { %v807_v57 = vsel %vm797_vm4, %v793_v36, 1326507024  ;;  %v804_v49 = vsel %vm796_vm3, %v787_v34, %v803_v40  ;;  %vm753_vm7 = vcmp.lt.s32.totalorder %v2675_v33, 2  ;;  %v798_v41 = vsel %vm794_vm1, %v778_v45, %v781_v39 }
 0x1ba   : > { %vm1633_vm5 = vcmp.lt.s32.totalorder %v1632_v44, 0  ;;  %v808_v59 = vsel %vm796_vm3, %v790_v7, %v807_v57  ;;  %v805_v32 = vsel %vm795_vm6, %v802_v11, %v804_v49  ;;  %vm750_vm8 = vweird.f32 %v2460_v23 }
 0x1bb   : > { %v1353_v5 = vsel %vm1633_vm5, 0, %v1632_v44  ;;  %v809_v62 = vsel %vm795_vm6, %v806_v43, %v808_v59  ;;  %v800_v50 = vsel %vm796_vm3, %v784_v52, %v799_v42  ;;  %vm1397_vm9 = vcmp.gt.s32.totalorder %v1396_v53, 0 }
 0x1bc   : > { %v1354_v3 = vsub.s32 32, %v1353_v5  ;;  %v1358_v63 = vsub.s32 4294967266, %v1353_v5  ;;  %v2741_v16 = vmul.u32.u64.low %v2679_v54, %v809_v62  ;;  %v2742_v51 = vmul.u32.u64.high %v2679_v54, %v809_v62, %v2741_v16 }
 0x1bd   : > { %v2745_v24 = vmul.u32.u64.low %v2679_v54, %v805_v32  ;;  %v2746_v56 = vmul.u32.u64.high %v2679_v54, %v805_v32, %v2745_v24  ;;  %v1355_v48 = vshll.u32 %v2682_v21, %v1353_v5  ;;  %v1398_v28 = vsel %vm1397_vm9, %v1396_v53, 0 }
 0x1be   : > { %v1356_v30 = vshrl.u32 %v1338_v14, %v1354_v3  ;;  %v1359_v27 = vadd.s32 127, %v1358_v63  ;;  %vm754_vm10 = vcmp.eq.s32.totalorder %v2675_v33, 0  ;;  %vm757_vm13 = vcmp.eq.s32.totalorder %v2675_v33, 2 }
 0x1bf   : > { %v1817_v58 = vpop.eup %1816  ;;  %v801_v25 = vsel %vm795_vm6, %v798_v41, %v800_v50  ;;  %v1400_v60 = vand.u32 31, %v1398_v28  ;;  %v1394_v12 = vor.u32 8388608, %v2705_v46  ;;  %v1371_v14 = vsel %vm2715_vm2, 0, %v2709_v29 }
 0x1c0   : > { %v1819_v9 = vpop.eup %1818  ;;  %v758_v2 = vxor.u32 2147483648, %v1817_v58  ;;  %v1357_v55 = vor.u32 %v1356_v30, %v1355_v48  ;;  %v1360_v39 = vshll.u32 %v1359_v27, 23  ;;  %vm819_vm14 = vc.u32 %v2742_v51, %v2745_v24 }
 0x1c1   : > { %v755_v31 = vxor.u32 2147483648, %v1819_v9  ;;  %v820_v21 = vadd.s32 1, %v2746_v56  ;;  %v817_v52 = vmul.u32 %v2679_v54, %v801_v25  ;;  %v1401_v34 = vsub.s32 32, %v1400_v60 }
 0x1c2   : > { %v759_v35 = vsel %vm757_vm13, %v758_v2, %v1819_v9  ;;  %v1361_v37 = vor.u32 4788187, %v1360_v39  ;;  %v1364_v61 = vcvt.s32.f32 %v1357_v55  ;;  %v1403_v22 = vshll.u32 %v1904_v0, %v1400_v60 }
 0x1c3   : > { %v756_v7 = vsel %vm754_vm10, %v1817_v58, %v755_v31  ;;  %v821_v13 = vsel %vm819_vm14, %v820_v21, %v2746_v56  ;;  %v1406_v45 = vshll.u32 %v1905_v4, %v1400_v60  ;;  %v1404_v54 = vshrl.u32 %v1905_v4, %v1401_v34 }
 0x1c4   : > { %v760_v46 = vsel %vm753_vm7, %v756_v7, %v759_v35  ;;  %v1362_v53 = vand.u32 2147483647, %v1361_v37  ;;  %v822_v29 = vadd.s32 %v821_v13, %v817_v52  ;;  %v1407_v44 = vshrl.u32 %v1906_v6, %v1401_v34 }
 0x1c5   : > { %v761_v36 = vsel %vm750_vm8, nan, %v760_v46  ;;  %v1409_v11 = vshll.u32 %v1906_v6, %v1400_v60  ;;  %v1410_v43 = vshrl.u32 %v1907_v8, %v1401_v34  ;;  %v1412_v33 = vshll.u32 %v1907_v8, %v1400_v60 }
 0x1c6   : > { %1493 = vst [vmem:[%s2333_s10 + $0x18] sm:$0xff] %v761_v36  ;;  %v1365_v42 = vmul.f32 %v1364_v61, %v1362_v53  ;;  %v823_v40 = vadd.s32 536870912, %v822_v29  ;;  %v1399_v57 = vshrl.u32 %v1398_v28, 5  ;;  %v1405_v49 = vor.u32 %v1404_v54, %v1403_v22 }
 0x1c7   : > { %v1413_v59 = vshrl.u32 %v1908_v10, %v1401_v34  ;;  %v1415_v23 = vshll.u32 %v1908_v10, %v1400_v60  ;;  %v1408_v32 = vor.u32 %v1407_v44, %v1406_v45  ;;  %v1416_v62 = vshrl.u32 %v1909_v18, %v1401_v34 }
 0x1c8   : > { %v1366_v5 = vxor.u32 2147483648, %v1365_v42  ;;  %v2779_v41 = vshrl.u32 %v823_v40, 30  ;;  %v2784_v63 = vadd.f32 %v2513_v15, %v2345_v19  ;;  %v1375_v16 = vadd.s32 3, %v1371_v14 }
 0x1c9   : > { %v1414_v3 = vor.u32 %v1413_v59, %v1412_v33  ;;  %v1411_v48 = vor.u32 %v1410_v43, %v1409_v11  ;;  %v1417_v27 = vor.u32 %v1416_v62, %v1415_v23  ;;  %vm1418_vm11 = vcmp.lt.s32.totalorder %v1399_v57, 1 }
 0x1ca   : > { %v1367_v50 = vsel %vm1284_vm0, %v1366_v5, %v1365_v42  ;;  %v825_v56 = vshll.u32 %v2779_v41, 30  ;;  %v1434_v28 = vshll.u32 %v1394_v12, 8  ;;  %vm1421_vm15 = vcmp.lt.s32.totalorder %v1399_v57, 4 }
 0x1cb   : > { %v1370_v30 = vsel %vm2715_vm2, %v2517_v1, %v1367_v50  ;;  %v1426_v19 = vsel %vm1418_vm11, %v1405_v49, %v1408_v32  ;;  %vm1420_vm12 = vcmp.lt.s32.totalorder %v1399_v57, 3  ;;  %v1427_v15 = vsel %vm1421_vm15, %v1414_v3, 920167782 }
 0x1cc   : > { %1820 = vcosq.f32 %v1370_v30  ;;  %v826_v58 = vsub.s32 %v822_v29, %v825_v56  ;;  %v869_v25 = vand.u32 2139095040, %v2784_v63  ;;  %v1402_v9 = vshrl.u32 %v1904_v0, %v1401_v34 }
 0x1cd   : > { %1822 = vsinq.f32 %v1370_v30  ;;  %vm1419_vm0 = vcmp.lt.s32.totalorder %v1399_v57, 2  ;;  %v1428_v38 = vsel %vm1420_vm12, %v1411_v48, %v1427_v15  ;;  %v1423_v2 = vsel %vm1421_vm15, %v1411_v48, 2102212464 }
 0x1ce   : > { %v828_v60 = vsub.s32 0, %v826_v58  ;;  %v1429_v55 = vsel %vm1419_vm0, %v1426_v19, %v1428_v38  ;;  %v1430_v39 = vsel %vm1418_vm11, %v1408_v32, %v1411_v48  ;;  %v1431_v12 = vsel %vm1421_vm15, %v1417_v27, 1326507024 }
 0x1cf   : > { %v1376_v31 = vand.u32 3, %v1375_v16  ;;  %v1432_v21 = vsel %vm1420_vm12, %v1414_v3, %v1431_v12  ;;  %v2800_v37 = vmul.u32.u64.low %v1434_v28, %v1429_v55  ;;  %v2801_v52 = vmul.u32.u64.high %v1434_v28, %v1429_v55, %v2800_v37 }
 0x1d0   : > { %v1611_v14 = vmin.u32 %v828_v60, %v826_v58  ;;  %v1433_v35 = vsel %vm1419_vm0, %v1430_v39, %v1432_v21  ;;  %v870_v34 = vshrl.u32 %v869_v25, 23  ;;  %v1422_v61 = vsel %vm1418_vm11, %v1402_v9, %v1405_v49 }
 0x1d1   : > { %v1424_v13 = vsel %vm1420_vm12, %v1408_v32, %v1423_v2  ;;  %v2806_v22 = vmul.u32.u64.low %v1434_v28, %v1433_v35  ;;  %v2807_v46 = vmul.u32.u64.high %v1434_v28, %v1433_v35, %v2806_v22  ;;  %vm1377_vm1 = vcmp.lt.s32.totalorder %v1376_v31, 2 }
 0x1d2   : > { %v830_v7 = vclz %v1611_v14  ;;  %v1614_v53 = vadd.s32 4294967169, %v870_v34  ;;  %v1425_v45 = vsel %vm1419_vm0, %v1422_v61, %v1424_v13  ;;  %v1444_v36 = vadd.s32 1, %v2801_v52 }
 0x1d3   : > { %vm1378_vm2 = vcmp.eq.s32.totalorder %v1376_v31, 0  ;;  %vm1381_vm3 = vcmp.eq.s32.totalorder %v1376_v31, 2  ;;  %v818_v11 = vadd.s32 %v2745_v24, %v2742_v51  ;;  %v848_v33 = vsub.s32 4, %v2779_v41 }
 0x1d4   : > { %v1612_v29 = vadd.s32 4294967294, %v830_v7  ;;  %v876_v54 = vadd.s32 1, %v1614_v53  ;;  %vm1443_vm5 = vc.u32 %v2807_v46, %v2800_v37  ;;  %v1441_v23 = vmul.u32 %v1434_v28, %v1425_v45 }
 0x1d5   : > { %v1445_v62 = vsel %vm1443_vm5, %v1444_v36, %v2801_v52  ;;  %vm1374_vm7 = vweird.f32 %v2517_v1  ;;  %v866_v56 = vand.u32 2147483647, %v2784_v63  ;;  %vm764_vm8 = vcmp.lt.s32.totalorder %v2615_v20, 0 }
 0x1d6   : > { %v1821_v44 = vpop.eup %1820  ;;  %vm1613_vm4 = vcmp.lt.s32.totalorder %v1612_v29, 0  ;;  %vm877_vm6 = vcmp.gt.s32.totalorder %v876_v54, 0  ;;  %v1446_v50 = vadd.s32 %v1445_v62, %v1441_v23  ;;  %v849_v25 = vsel %vm764_vm8, %v848_v33, %v2779_v41 }
 0x1d7   : > { %v1823_v42 = vpop.eup %1822  ;;  %v1382_v40 = vxor.u32 2147483648, %v1821_v44  ;;  %v833_v43 = vsel %vm1613_vm4, 0, %v1612_v29  ;;  %v878_v48 = vsel %vm877_vm6, %v876_v54, 0  ;;  %v873_v1 = vand.u32 8388607, %v866_v56 }
 0x1d8   : > { %v1379_v57 = vxor.u32 2147483648, %v1823_v42  ;;  %v834_v49 = vsub.s32 32, %v833_v43  ;;  %v838_v59 = vsub.s32 4294967266, %v833_v43  ;;  %v835_v32 = vshll.u32 %v826_v58, %v833_v43 }
 0x1d9   : > { %v1383_v5 = vsel %vm1381_vm3, %v1382_v40, %v1823_v42  ;;  %v1447_v19 = vadd.s32 536870912, %v1446_v50  ;;  %v880_v58 = vand.u32 31, %v878_v48  ;;  %vm2832_vm9 = vcmp.le.f32.partialorder %v762_v26, 0.7853982 }
 0x1da   : > { %v1380_v51 = vsel %vm1378_vm2, %v1821_v44, %v1379_v57  ;;  %v836_v24 = vshrl.u32 %v818_v11, %v834_v49  ;;  %v839_v3 = vadd.s32 127, %v838_v59  ;;  %v851_v12 = vsel %vm2832_vm9, 0, %v849_v25 }
 0x1db   : > { %v1384_v16 = vsel %vm1377_vm1, %v1380_v51, %v1383_v5  ;;  %v2826_v60 = vshrl.u32 %v1447_v19, 30  ;;  %v881_v9 = vsub.s32 32, %v880_v58  ;;  %v883_v26 = vshll.u32 %v1904_v0, %v880_v58 }
 0x1dc   : > { %v1385_v30 = vsel %vm1374_vm7, nan, %v1384_v16  ;;  %v837_v27 = vor.u32 %v836_v24, %v835_v32  ;;  %v840_v28 = vshll.u32 %v839_v3, 23  ;;  %v874_v34 = vor.u32 8388608, %v873_v1 }
 0x1dd   : > { %1499 = vst [vmem:[%s2333_s10 + $0x48] sm:$0xff] %v1385_v30  ;;  %v1449_v39 = vshll.u32 %v2826_v60, 30  ;;  %v884_v41 = vshrl.u32 %v1905_v4, %v881_v9  ;;  %v887_v31 = vshrl.u32 %v1906_v6, %v881_v9  ;;  %v890_v14 = vshrl.u32 %v1907_v8, %v881_v9 }
 0x1de   : > { %v841_v15 = vor.u32 4788187, %v840_v28  ;;  %v844_v55 = vcvt.s32.f32 %v837_v27  ;;  %v893_v52 = vshrl.u32 %v1908_v10, %v881_v9  ;;  %v879_v7 = vshrl.u32 %v878_v48, 5 }
 0x1df   : > { %v1450_v35 = vsub.s32 %v1446_v50, %v1449_v39  ;;  %v886_v61 = vshll.u32 %v1905_v4, %v880_v58  ;;  %v889_v13 = vshll.u32 %v1906_v6, %v880_v58  ;;  %v885_v29 = vor.u32 %v884_v41, %v883_v26 }
 0x1e0   : > { %v842_v2 = vand.u32 2147483647, %v841_v15  ;;  %v892_v45 = vshll.u32 %v1907_v8, %v880_v58  ;;  %v895_v44 = vshll.u32 %v1908_v10, %v880_v58  ;;  %v896_v11 = vshrl.u32 %v1909_v18, %v881_v9 }
 0x1e1   : > { %v1452_v53 = vsub.s32 0, %v1450_v35  ;;  %v888_v36 = vor.u32 %v887_v31, %v886_v61  ;;  %v891_v54 = vor.u32 %v890_v14, %v889_v13  ;;  %v855_v6 = vadd.s32 3, %v851_v12 }
 0x1e2   : > { %v845_v21 = vmul.f32 %v844_v55, %v842_v2  ;;  %v894_v43 = vor.u32 %v893_v52, %v892_v45  ;;  %v897_v33 = vor.u32 %v896_v11, %v895_v44  ;;  %v914_v57 = vshll.u32 %v874_v34, 8 }
 0x1e3   : > { %v1635_v40 = vmin.u32 %v1452_v53, %v1450_v35  ;;  %vm898_vm10 = vcmp.lt.s32.totalorder %v879_v7, 1  ;;  %vm901_vm13 = vcmp.lt.s32.totalorder %v879_v7, 4  ;;  %v882_v10 = vshrl.u32 %v1904_v0, %v881_v9 }
 0x1e4   : > { %v846_v22 = vxor.u32 2147483648, %v845_v21  ;;  %v903_v18 = vsel %vm901_vm13, %v891_v54, 2102212464  ;;  %v906_v49 = vsel %vm898_vm10, %v885_v29, %v888_v36  ;;  %vm900_vm14 = vcmp.lt.s32.totalorder %v879_v7, 3 }
 0x1e5   : > { %v1454_v8 = vclz %v1635_v40  ;;  %v907_v23 = vsel %vm901_vm13, %v894_v43, 920167782  ;;  %v910_v5 = vsel %vm898_vm10, %v888_v36, %v891_v54  ;;  %vm899_vm11 = vcmp.lt.s32.totalorder %v879_v7, 2 }
 0x1e6   : > { %v847_v42 = vsel %vm764_vm8, %v846_v22, %v845_v21  ;;  %v902_v32 = vsel %vm898_vm10, %v882_v10, %v885_v29  ;;  %v908_v62 = vsel %vm900_vm14, %v891_v54, %v907_v23  ;;  %v911_v51 = vsel %vm901_vm13, %v897_v33, 1326507024 }
 0x1e7   : > { %v850_v4 = vsel %vm2832_vm9, %v2615_v20, %v847_v42  ;;  %v1636_v59 = vadd.s32 4294967294, %v1454_v8  ;;  %v904_v24 = vsel %vm900_vm14, %v888_v36, %v903_v18  ;;  %v909_v3 = vsel %vm899_vm11, %v906_v49, %v908_v62 }
 0x1e8   : > { %1824 = vcosq.f32 %v850_v4  ;;  %v912_v50 = vsel %vm900_vm14, %v894_v43, %v911_v51  ;;  %v2857_v30 = vmul.u32.u64.low %v914_v57, %v909_v3  ;;  %v2858_v0 = vmul.u32.u64.high %v914_v57, %v909_v3, %v2857_v30 }
 0x1e9   : > { %1826 = vsinq.f32 %v850_v4  ;;  %vm1637_vm15 = vcmp.lt.s32.totalorder %v1636_v59, 0  ;;  %v913_v48 = vsel %vm899_vm11, %v910_v5, %v912_v50  ;;  %v1442_v27 = vadd.s32 %v2800_v37, %v2807_v46 }
 0x1ea   : > { %v1457_v16 = vsel %vm1637_vm15, 0, %v1636_v59  ;;  %v856_v58 = vand.u32 3, %v855_v6  ;;  %v2862_v15 = vmul.u32.u64.low %v914_v57, %v913_v48  ;;  %v2863_v25 = vmul.u32.u64.high %v914_v57, %v913_v48, %v2862_v15 }
 0x1eb   : > { %v1458_v28 = vsub.s32 32, %v1457_v16  ;;  %v1462_v19 = vsub.s32 4294967266, %v1457_v16  ;;  %v1459_v1 = vshll.u32 %v1450_v35, %v1457_v16  ;;  %v905_v2 = vsel %vm899_vm11, %v902_v32, %v904_v24 }
 0x1ec   : > { %v924_v55 = vadd.s32 1, %v2858_v0  ;;  %v921_v21 = vmul.u32 %v914_v57, %v905_v2  ;;  %vm923_vm12 = vc.u32 %v2863_v25, %v2857_v30  ;;  %vm861_vm0 = vcmp.eq.s32.totalorder %v856_v58, 2 }
 0x1ed   : > { %v1460_v9 = vshrl.u32 %v1442_v27, %v1458_v28  ;;  %v1463_v38 = vadd.s32 127, %v1462_v19  ;;  %vm858_vm1 = vcmp.eq.s32.totalorder %v856_v58, 0  ;;  %vm857_vm2 = vcmp.lt.s32.totalorder %v856_v58, 2 }
 0x1ee   : > { %v925_v35 = vsel %vm923_vm12, %v924_v55, %v2858_v0  ;;  %vm854_vm3 = vweird.f32 %v2615_v20  ;;  %v1472_v45 = vsub.s32 4, %v2826_v60  ;;  %vm1388_vm4 = vcmp.lt.s32.totalorder %v2654_v47, 0 }
 0x1ef   : > { %v1461_v12 = vor.u32 %v1460_v9, %v1459_v1  ;;  %v1464_v41 = vshll.u32 %v1463_v38, 23  ;;  %v926_v52 = vadd.s32 %v925_v35, %v921_v21  ;;  %vm1387_vm5 = vcmp.le.f32.partialorder %v1386_v17, 0.7853982 }
 0x1f0   : > { %v1473_v42 = vsel %vm1388_vm4, %v1472_v45, %v2826_v60  ;;  %v922_v23 = vadd.s32 %v2857_v30, %v2863_v25  ;;  %vm1478_vm10 = vweird.f32 %v2654_v47  ;;  %vm868_vm13 = vcmp.lt.s32.totalorder %v2784_v63, 0 }
 0x1f1   : > { %v1465_v46 = vor.u32 4788187, %v1464_v41  ;;  %v1468_v61 = vcvt.s32.f32 %v1461_v12  ;;  %v927_v22 = vadd.s32 536870912, %v926_v52  ;;  %v1475_v43 = vsel %vm1387_vm5, 0, %v1473_v42 }
 0x1f2   : > { %v1825_v39 = vpop.eup %1824  ;;  %v1479_v33 = vadd.s32 3, %v1475_v43  ;;  %vm867_vm14 = vcmp.le.f32.partialorder %v866_v56, 0.7853982 }
 0x1f3   : > { %v1827_v31 = vpop.eup %1826  ;;  %v862_v14 = vxor.u32 2147483648, %v1825_v39  ;;  %v1466_v7 = vand.u32 2147483647, %v1465_v46  ;;  %v928_v36 = vshrl.u32 %v927_v22, 30 }
 0x1f4   : > { %v859_v37 = vxor.u32 2147483648, %v1827_v31  ;;  %v1480_v10 = vand.u32 3, %v1479_v33 }
 0x1f5   : > { %v863_v26 = vsel %vm861_vm0, %v862_v14, %v1827_v31  ;;  %v1469_v29 = vmul.f32 %v1468_v61, %v1466_v7  ;;  %v929_v44 = vshll.u32 %v928_v36, 30  ;;  %v952_v15 = vsub.s32 4, %v928_v36 }
 0x1f6   : > { %v860_v34 = vsel %vm858_vm1, %v1825_v39, %v859_v37  ;;  %vm1482_vm7 = vcmp.eq.s32.totalorder %v1480_v10, 0  ;;  %vm1485_vm8 = vcmp.eq.s32.totalorder %v1480_v10, 2  ;;  %vm1481_vm9 = vcmp.lt.s32.totalorder %v1480_v10, 2 }
 0x1f7   : > { %v864_v13 = vsel %vm857_vm2, %v860_v34, %v863_v26  ;;  %v1470_v54 = vxor.u32 2147483648, %v1469_v29  ;;  %v930_v40 = vsub.s32 %v926_v52, %v929_v44  ;;  %vm958_vm0 = vweird.f32 %v2784_v63 }
 0x1f8   : > { %v865_v53 = vsel %vm854_vm3, nan, %v864_v13 }
 0x1f9   : > { %1494 = vst [vmem:[%s2333_s10 + $0x20] sm:$0xff] %v865_v53  ;;  %v1471_v11 = vsel %vm1388_vm4, %v1470_v54, %v1469_v29  ;;  %v932_v4 = vsub.s32 0, %v930_v40 }
 0x1fa   : > { %v1474_v20 = vsel %vm1387_vm5, %v2654_v47, %v1471_v11  ;;  %v953_v47 = vsel %vm868_vm13, %v952_v15, %v928_v36 }
 0x1fb   : > { %1828 = vcosq.f32 %v1474_v20  ;;  %v1615_v6 = vmin.u32 %v932_v4, %v930_v40  ;;  %v955_v38 = vsel %vm867_vm14, 0, %v953_v47 }
 0x1fc   : > { %1830 = vsinq.f32 %v1474_v20  ;;  %v959_v2 = vadd.s32 3, %v955_v38 }
 0x1fd   : > { %v934_v57 = vclz %v1615_v6 }
 0x1fe   : > { %v960_v55 = vand.u32 3, %v959_v2 }
 0x1ff   : > { %v1616_v8 = vadd.s32 4294967294, %v934_v57 }
 0x200   : > { %vm965_vm11 = vcmp.eq.s32.totalorder %v960_v55, 2  ;;  %vm962_vm15 = vcmp.eq.s32.totalorder %v960_v55, 0  ;;  %vm961_vm12 = vcmp.lt.s32.totalorder %v960_v55, 2 }
 0x201   : > { %vm1617_vm6 = vcmp.lt.s32.totalorder %v1616_v8, 0 }
 0x202   : > { %v937_v49 = vsel %vm1617_vm6, 0, %v1616_v8 }
 0x203   : > { %v938_v60 = vsub.s32 32, %v937_v49  ;;  %v942_v5 = vsub.s32 4294967266, %v937_v49  ;;  %v939_v51 = vshll.u32 %v930_v40, %v937_v49 }
 0x205   : > { %v1829_v18 = vpop.eup %1828  ;;  %v940_v24 = vshrl.u32 %v922_v23, %v938_v60  ;;  %v943_v3 = vadd.s32 127, %v942_v5 }
 0x206   : > { %v1831_v59 = vpop.eup %1830  ;;  %v1486_v17 = vxor.u32 2147483648, %v1829_v18 }
 0x207   : > { %v1483_v32 = vxor.u32 2147483648, %v1831_v59  ;;  %v941_v48 = vor.u32 %v940_v24, %v939_v51  ;;  %v944_v0 = vshll.u32 %v943_v3, 23 }
 0x208   : > { %v1487_v62 = vsel %vm1485_vm8, %v1486_v17, %v1831_v59 }
 0x209   : > { %v1484_v50 = vsel %vm1482_vm7, %v1829_v18, %v1483_v32  ;;  %v945_v30 = vor.u32 4788187, %v944_v0  ;;  %v948_v19 = vcvt.s32.f32 %v941_v48 }
 0x20a   : > { %v1488_v16 = vsel %vm1481_vm9, %v1484_v50, %v1487_v62 }
 0x20b   : > { %v1489_v27 = vsel %vm1478_vm10, nan, %v1488_v16  ;;  %v946_v28 = vand.u32 2147483647, %v945_v30 }
 0x20c   : > { %1500 = vst [vmem:[%s2333_s10 + $0x50] sm:$0xff] %v1489_v27 }
 0x20d   : > { %v949_v58 = vmul.f32 %v948_v19, %v946_v28 }
 0x20f   : > { %v950_v25 = vxor.u32 2147483648, %v949_v58 }
 0x211   : > { %v951_v1 = vsel %vm868_vm13, %v950_v25, %v949_v58 }
 0x212   : > { %v954_v9 = vsel %vm867_vm14, %v2784_v63, %v951_v1 }
 0x213   : > { %1832 = vcosq.f32 %v954_v9 }
 0x214   : > { %1834 = vsinq.f32 %v954_v9 }
 0x21d   : > { %v1833_v39 = vpop.eup %1832 }
 0x21e   : > { %v1835_v12 = vpop.eup %1834  ;;  %v966_v41 = vxor.u32 2147483648, %v1833_v39 }
 0x21f   : > { %v963_v31 = vxor.u32 2147483648, %v1835_v12 }
 0x220   : > { %v967_v56 = vsel %vm965_vm11, %v966_v41, %v1835_v12 }
 0x221   : > { %v964_v14 = vsel %vm962_vm15, %v1833_v39, %v963_v31 }
 0x222   : > { %v968_v21 = vsel %vm961_vm12, %v964_v14, %v967_v56 }
 0x223   : > { %v969_v37 = vsel %vm958_vm0, nan, %v968_v21 }
 0x224   : > { %1495 = vst [vmem:[%s2333_s10 + $0x28] sm:$0xff] %v969_v37 }
 0x225   : > { %1850 = shalt.err (!%p1847_p3)
}
 0x226   : > { %s1851_s4 = scalar_lea.hbm %s2889_s26, 1408  ;;  %s1855_s7 = scalar_lea.hbm %s2941_s3, 4224 }
 0x227   : > { %p1852_p4 = scmp.ne.s32.totalorder %s2889_s26, %s1851_s4  ;;  %p1856_p9 = scmp.lt.u32.totalorder %s2889_s26, %s2941_s3 }
 0x228   : > { %p1857_p10 = scmp.lt.u32.totalorder %s1855_s7, %s1851_s4  ;;  %p1859_p12 = scmp.lt.u32.totalorder %s1851_s4, %s2889_s26 }
 0x229   : > { %p1853_p7 = pnand %p1852_p4, %p1971_p5 }
 0x22a   : > { %p1858_p11 = por %p1857_p10, %p1856_p9 }
 0x22b   : > { %p1854_p8 = pneg %p1853_p7 }
 0x22c   : > { %p1860_p13 = por %p1859_p12, %p1858_p11 }
 0x22e   : > { %p1861_p0 = pnand %p1860_p13, %p1854_p8 }
 0x230   : > { %1864 = shalt.err (!%p1861_p0)
}
 0x231   : > { %s1911_s10 = smov 128   ;;  %s1912_s11 = smov 8  }
 0x232   : > { %1742 = dma.vmem_to_hbm [thread:$0]  (%p1971_p5), %s2892_s20, 1408, %s2889_s26, %s2897_s16, %s1911_s10, %s1911_s10, %s1912_s11  }
 0x233 PF: > { %p1748_p1 = scmp.ge.s32.totalorder %s1899_s15, 2  ;;  %s1530_s17 = sand.u32 1, %s1887_s12  }
 0x234   : > { %s1531_s19 = scalar_lea.sflag [#allocation3], %s1530_s17 }
 0x235   : > { %p1745_p2 = pnand %p1748_p1, %p1975_p6 }
 0x237   : > { %1882 = dma.done.wait (!%p1745_p2), %s1531_s19, 1408  }
 0x238   : > { %1884 = vsyncadd (!%p1745_p2), %s1531_s19, 4294965888  ;;  %p13_p3 = scmp.ge.s32.totalorder %s1958_s18, 5   ;;  %s2962_s12 = smov %s1891_s13 }
 0x239   : > { %s2963_s13 = smov %s1895_s14  ;;  %s2964_s14 = smov %s1969_s21 }
 0x23a   : > { %s2965_s15 = smov %s1958_s18  ;;  %15 = sbr.rel (!%p13_p3) target bundleno = 3 (0x3), region = 67 }
 0x241   :  { %1536 = vsyncpa [#allocation3], 1 }
 0x242   :  { %1538 = vsyncpa [#allocation3 + $0x1], 1 }

</bundles_post_ra>
